<compile_context>
chip_gen: v5e
topology: v5e:2x2
jax: 0.10.0
libtpu: 0.0.40
codegen_flags: <defaults>
</compile_context>

<pallas_src>
import functools

import numpy as np
import jax
import jax.numpy as jnp
from jax.experimental import pallas as pl
from jax.experimental.pallas import tpu as pltpu


# ---------------------------------------------------------------------------
# 1-D bilinear interpolation matrix (torch F.interpolate, align_corners=False)
# ---------------------------------------------------------------------------
@functools.lru_cache(maxsize=None)
def _bilinear_matrix(in_size: int, out_size: int) -> np.ndarray:
    scale = in_size / out_size
    o = np.arange(out_size, dtype=np.float64)
    src = (o + 0.5) * scale - 0.5
    src = np.maximum(src, 0.0)                      # torch clamps source coord >= 0
    x0 = np.floor(src).astype(np.int64)
    x0 = np.minimum(x0, in_size - 1)
    x1 = np.minimum(x0 + 1, in_size - 1)
    w1 = (src - x0).astype(np.float32)
    w0 = (1.0 - w1).astype(np.float32)
    W = np.zeros((out_size, in_size), dtype=np.float32)
    rows = np.arange(out_size)
    np.add.at(W, (rows, x0), w0)
    np.add.at(W, (rows, x1), w1)
    return W
    # TODO(synk): torchvision Resize may antialias on downsample; this pipeline only
    # upsamples (184->224, 16->224), where antialias is a no-op, so this is exact.


# ---------------------------------------------------------------------------
# Wrapper (forward pass): one fused, batched Pallas kernel, jitted & cached
# ---------------------------------------------------------------------------
@functools.partial(
    jax.jit,
    static_argnames=("output_size", "normalize", "discretize", "num_buckets", "pad_tb"))
def preprocessing_pipeline(image, labels=None, *,
                           output_size=(224, 224),
                           normalize=False,
                           discretize=True,
                           num_buckets=5,
                           pad_tb=84):
    img = jnp.asarray(image, jnp.float32)
    squeeze_batch = (img.ndim == 3)                 # single HWC image (module semantics)
    if squeeze_batch:
        img = img[None]
    B, H, W, C = img.shape
    H_out, W_out = output_size
    H_pad = H + 2 * pad_tb

    # HWC -> CHW per image, collapse (C,H) for the fused stage-1 matmul.
    img_flat = jnp.transpose(img, (0, 3, 1, 2)).reshape(B, C * H, W)   # (B, C*H, W)

    # Pad((0, 84)) folded into the row interpolation matrix: padded rows are zero,
    # so only the columns hitting the real image contribute.  Compile-time constants.
    wy_eff = jnp.asarray(_bilinear_matrix(H_pad, H_out)[:, pad_tb:pad_tb + H])  # (H_out, H)
    wxt = jnp.asarray(_bilinear_matrix(W, W_out).T)                             # (W, W_out)

    if normalize:
        mean = [0.485, 0.456, 0.406][:C]
        std = [0.229, 0.224, 0.225][:C]
        scale = tuple(float(1.0 / s) for s in std)             # baked-in constants
        offset = tuple(float(-m / s) for m, s in zip(mean, std))
    else:
        scale = offset = None

    do_labels = bool(discretize) and labels is not None
    if do_labels:
        lbl = jnp.asarray(labels, jnp.float32).reshape(1, -1)                   # (1, N)
        n_lbl = lbl.shape[1]
        # np.digitize(labels, bins=linspace(0,1,K+1), right=False) - 1
        bin_edges = tuple(float(e) for e in np.linspace(0.0, 1.0, num_buckets + 1))
        # TODO(synk): if n_lbl grows, pad it to a multiple of 128 so the final label
        # store is an unmasked lane-dense vst (negligible at N=8).

    def kernel(*refs):
        if do_labels:
            img_ref, wy_ref, wxt_ref, lbl_ref, out_img_ref, out_lbl_ref = refs
        else:
            img_ref, wy_ref, wxt_ref, out_img_ref = refs

        wy = wy_ref[...]                                    # (H_out, H)   resident
        wxt_m = wxt_ref[...]                                # (W, W_out)   resident
        x = img_ref[0]                                      # (C*H, W)

        # Stage 1, fused over channels: lane-dense intermediate (C*H, W_out).
        t = jnp.dot(x, wxt_m, preferred_element_type=jnp.float32)
        for c in range(C):                                  # static, tiny (C = 3)
            xc = t[c * H:(c + 1) * H, :]                    # sublane-aligned slice
            res = jnp.dot(wy, xc, preferred_element_type=jnp.float32)   # (H_out, W_out)
            if normalize:
                res = res * scale[c] + offset[c]            # constants folded at trace
            out_img_ref[0, c] = res

        if do_labels:
            # Written identically on every grid step (and on both cores under the
            # parallel batch split) -> benign redundant VPU work, race-free result.
            l = lbl_ref[...]                                # (1, N) float32
            acc = jnp.zeros(l.shape, jnp.int32)
            for e in bin_edges:                             # static, num_buckets+1 edges
                acc = acc + (l >= e).astype(jnp.int32)
            out_lbl_ref[...] = acc - 1                      # digitize(right=False) - 1

    in_arrays = [img_flat, wy_eff, wxt]
    in_specs = [
        pl.BlockSpec((1, C * H, W), lambda b: (b, 0, 0)),
        pl.BlockSpec((H_out, H), lambda b: (0, 0)),         # invariant -> DMA'd once
        pl.BlockSpec((W, W_out), lambda b: (0, 0)),         # invariant -> DMA'd once
    ]
    out_shapes = [jax.ShapeDtypeStruct((B, C, H_out, W_out), jnp.float32)]
    out_specs = [pl.BlockSpec((1, C, H_out, W_out), lambda b: (b, 0, 0, 0))]
    if do_labels:
        in_arrays.append(lbl)
        in_specs.append(pl.BlockSpec((1, n_lbl), lambda b: (0, 0)))
        out_shapes.append(jax.ShapeDtypeStruct((1, n_lbl), jnp.int32))
        out_specs.append(pl.BlockSpec((1, n_lbl), lambda b: (0, 0)))

    outs = pl.pallas_call(
        kernel,
        out_shape=tuple(out_shapes),
        grid=(B,),
        in_specs=in_specs,
        out_specs=tuple(out_specs),
        compiler_params=pltpu.CompilerParams(
            dimension_semantics=("parallel",)),   # v7x: shard batch across both TCs
    )(*in_arrays)

    if do_labels:
        out_img, out_lbl2d = outs
        out_lbl = out_lbl2d.reshape(-1)
    else:
        (out_img,) = outs
        out_lbl = None if labels is None else jnp.asarray(labels, jnp.float32)

    if squeeze_batch:
        out_img = out_img[0]
    return out_img, out_lbl


# ---------------------------------------------------------------------------
# Main
# ---------------------------------------------------------------------------
if __name__ == "__main__":
    key = jax.random.PRNGKey(0)
    k_img, k_lbl = jax.random.split(key)

    B, H, W, C = 2, 16, 16, 3
    N_LABELS = 8
    images = jax.random.uniform(k_img, (B, H, W, C), dtype=jnp.float32)   # batched HWC
    labels = jax.random.uniform(k_lbl, (N_LABELS,), dtype=jnp.float32,
                                minval=0.0, maxval=0.999)                 # in [0, 1)

    out_img, out_lbl = preprocessing_pipeline(images, labels)
    out_img = jax.block_until_ready(out_img)
    out_lbl = jax.block_until_ready(out_lbl)

    assert out_img.shape == (B, 3, 224, 224) and out_img.dtype == jnp.float32

    # --- reference: ORIGINAL pad + full-Wy formulation, per image (verifies that the
    #     pad fold, matmul reorder and stage-1 fusion are exact) ---
    wy_full = _bilinear_matrix(H + 168, 224)
    wxt_ref = _bilinear_matrix(W, 224).T
    for b in range(B):
        img_chw = np.transpose(np.asarray(images[b]), (2, 0, 1))
        img_pad = np.pad(img_chw, ((0, 0), (84, 84), (0, 0)))
        ref_img = np.einsum("oh,chw,wx->cox", wy_full, img_pad, wxt_ref)
        assert np.allclose(np.asarray(out_img[b]), ref_img, atol=1e-4, rtol=1e-4)

    bins_np = np.linspace(0, 1, 6)
    ref_lbl = np.digitize(np.asarray(labels), bins=bins_np, right=False) - 1
    assert out_lbl.dtype == jnp.int32
    assert np.array_equal(np.asarray(out_lbl), ref_lbl.astype(np.int32))

    # --- single-image path (matches the original module's (H,W,C) forward) ---
    single_img, single_lbl = preprocessing_pipeline(images[0], labels)
    single_img = jax.block_until_ready(single_img)
    assert single_img.shape == (3, 224, 224)
    assert np.allclose(np.asarray(single_img), np.asarray(out_img[0]), atol=1e-5)
    assert np.array_equal(np.asarray(single_lbl), np.asarray(out_lbl))

    print("KERNEL_OK")
</pallas_src>

<mosaic_0001>
module attributes {stable_mosaic.version = 11 : i64} {
  func.func @kernel(%arg0: i32, %arg1: memref<1x48x16xf32, #tpu.memory_space<vmem>>, %arg2: memref<224x16xf32, #tpu.memory_space<vmem>>, %arg3: memref<16x224xf32, #tpu.memory_space<vmem>>, %arg4: memref<1x8xf32, #tpu.memory_space<vmem>>, %arg5: memref<1x3x224x224xf32, #tpu.memory_space<vmem>>, %arg6: memref<1x8xi32, #tpu.memory_space<vmem>>) attributes {dimension_semantics = [#tpu.dimension_semantics<parallel>], iteration_bounds = array<i64: 2>, scalar_prefetch = 0 : i64, scratch_operands = 0 : i64, tpu.core_type = #tpu.core_type<tc>, window_params = [{transform_indices = @transform_0, window_bounds = array<i64: 1, 48, 16>}, {pipeline_mode = #tpu.pipeline_mode<synchronous>, transform_indices = @transform_1, window_bounds = array<i64: 224, 16>}, {pipeline_mode = #tpu.pipeline_mode<synchronous>, transform_indices = @transform_2, window_bounds = array<i64: 16, 224>}, {pipeline_mode = #tpu.pipeline_mode<synchronous>, transform_indices = @transform_3, window_bounds = array<i64: 1, 8>}, {transform_indices = @transform_4, window_bounds = array<i64: 1, 3, 224, 224>}, {pipeline_mode = #tpu.pipeline_mode<synchronous>, transform_indices = @transform_5, window_bounds = array<i64: 1, 8>}]} {
    %c0 = arith.constant 0 : index
    %c0_0 = arith.constant 0 : index
    %0 = vector.load %arg2[%c0, %c0_0] : memref<224x16xf32, #tpu.memory_space<vmem>>, vector<224x16xf32>
    %c0_1 = arith.constant 0 : index
    %c0_2 = arith.constant 0 : index
    %1 = vector.load %arg3[%c0_1, %c0_2] : memref<16x224xf32, #tpu.memory_space<vmem>>, vector<16x224xf32>
    %c0_3 = arith.constant 0 : index
    %c0_4 = arith.constant 0 : index
    %c0_5 = arith.constant 0 : index
    %2 = vector.load %arg1[%c0_3, %c0_4, %c0_5] : memref<1x48x16xf32, #tpu.memory_space<vmem>>, vector<1x48x16xf32>
    %3 = vector.shape_cast %2 : vector<1x48x16xf32> to vector<48x16xf32>
    %cst = arith.constant dense<0.000000e+00> : vector<48x224xf32>
    %4 = tpu.matmul %3, %1, %cst {dimension_numbers = #tpu.dot_dimension_numbers<[1], [0], [0], [1], [0, 0, 1, 1], [], []>} : vector<48x16xf32>, vector<16x224xf32>, vector<48x224xf32> -> vector<48x224xf32>
    %5 = vector.extract_strided_slice %4 {offsets = [0, 0], sizes = [16, 224], strides = [1, 1]} : vector<48x224xf32> to vector<16x224xf32>
    %cst_6 = arith.constant dense<0.000000e+00> : vector<224x224xf32>
    %6 = tpu.matmul %0, %5, %cst_6 {dimension_numbers = #tpu.dot_dimension_numbers<[1], [0], [0], [1], [0, 0, 1, 1], [], []>} : vector<224x16xf32>, vector<16x224xf32>, vector<224x224xf32> -> vector<224x224xf32>
    %c0_7 = arith.constant 0 : index
    %c0_8 = arith.constant 0 : index
    %c0_9 = arith.constant 0 : index
    %c0_10 = arith.constant 0 : index
    %7 = vector.load %arg5[%c0_7, %c0_8, %c0_9, %c0_10] : memref<1x3x224x224xf32, #tpu.memory_space<vmem>>, vector<1x1x224x224xf32>
    %8 = vector.shape_cast %7 : vector<1x1x224x224xf32> to vector<224x224xf32>
    %9 = vector.shape_cast %6 : vector<224x224xf32> to vector<1x1x224x224xf32>
    tpu.vector_store %arg5[%c0_7, %c0_8, %c0_9, %c0_10], %9 {strides = array<i32>} : memref<1x3x224x224xf32, #tpu.memory_space<vmem>>, vector<1x1x224x224xf32>,
    %10 = vector.extract_strided_slice %4 {offsets = [16, 0], sizes = [16, 224], strides = [1, 1]} : vector<48x224xf32> to vector<16x224xf32>
    %cst_11 = arith.constant dense<0.000000e+00> : vector<224x224xf32>
    %11 = tpu.matmul %0, %10, %cst_11 {dimension_numbers = #tpu.dot_dimension_numbers<[1], [0], [0], [1], [0, 0, 1, 1], [], []>} : vector<224x16xf32>, vector<16x224xf32>, vector<224x224xf32> -> vector<224x224xf32>
    %c0_12 = arith.constant 0 : index
    %c1 = arith.constant 1 : index
    %c0_13 = arith.constant 0 : index
    %c0_14 = arith.constant 0 : index
    %12 = vector.load %arg5[%c0_12, %c1, %c0_13, %c0_14] : memref<1x3x224x224xf32, #tpu.memory_space<vmem>>, vector<1x1x224x224xf32>
    %13 = vector.shape_cast %12 : vector<1x1x224x224xf32> to vector<224x224xf32>
    %14 = vector.shape_cast %11 : vector<224x224xf32> to vector<1x1x224x224xf32>
    tpu.vector_store %arg5[%c0_12, %c1, %c0_13, %c0_14], %14 {strides = array<i32>} : memref<1x3x224x224xf32, #tpu.memory_space<vmem>>, vector<1x1x224x224xf32>,
    %15 = vector.extract_strided_slice %4 {offsets = [32, 0], sizes = [16, 224], strides = [1, 1]} : vector<48x224xf32> to vector<16x224xf32>
    %cst_15 = arith.constant dense<0.000000e+00> : vector<224x224xf32>
    %16 = tpu.matmul %0, %15, %cst_15 {dimension_numbers = #tpu.dot_dimension_numbers<[1], [0], [0], [1], [0, 0, 1, 1], [], []>} : vector<224x16xf32>, vector<16x224xf32>, vector<224x224xf32> -> vector<224x224xf32>
    %c0_16 = arith.constant 0 : index
    %c2 = arith.constant 2 : index
    %c0_17 = arith.constant 0 : index
    %c0_18 = arith.constant 0 : index
    %17 = vector.load %arg5[%c0_16, %c2, %c0_17, %c0_18] : memref<1x3x224x224xf32, #tpu.memory_space<vmem>>, vector<1x1x224x224xf32>
    %18 = vector.shape_cast %17 : vector<1x1x224x224xf32> to vector<224x224xf32>
    %19 = vector.shape_cast %16 : vector<224x224xf32> to vector<1x1x224x224xf32>
    tpu.vector_store %arg5[%c0_16, %c2, %c0_17, %c0_18], %19 {strides = array<i32>} : memref<1x3x224x224xf32, #tpu.memory_space<vmem>>, vector<1x1x224x224xf32>,
    %c0_19 = arith.constant 0 : index
    %c0_20 = arith.constant 0 : index
    %20 = vector.load %arg4[%c0_19, %c0_20] : memref<1x8xf32, #tpu.memory_space<vmem>>, vector<1x8xf32>
    %c0_i32 = arith.constant 0 : i32
    %21 = vector.broadcast %c0_i32 : i32 to vector<1x8xi32>
    %cst_21 = arith.constant 0.000000e+00 : f32
    %22 = vector.broadcast %cst_21 : f32 to vector<1x8xf32>
    %23 = arith.cmpf oge, %20, %22 : vector<1x8xf32>
    %24 = arith.extui %23 : vector<1x8xi1> to vector<1x8xi32>
    %25 = arith.addi %21, %24 : vector<1x8xi32>
    %cst_22 = arith.constant 2.000000e-01 : f32
    %26 = vector.broadcast %cst_22 : f32 to vector<1x8xf32>
    %27 = arith.cmpf oge, %20, %26 : vector<1x8xf32>
    %28 = arith.extui %27 : vector<1x8xi1> to vector<1x8xi32>
    %29 = arith.addi %25, %28 : vector<1x8xi32>
    %cst_23 = arith.constant 4.000000e-01 : f32
    %30 = vector.broadcast %cst_23 : f32 to vector<1x8xf32>
    %31 = arith.cmpf oge, %20, %30 : vector<1x8xf32>
    %32 = arith.extui %31 : vector<1x8xi1> to vector<1x8xi32>
    %33 = arith.addi %29, %32 : vector<1x8xi32>
    %cst_24 = arith.constant 6.000000e-01 : f32
    %34 = vector.broadcast %cst_24 : f32 to vector<1x8xf32>
    %35 = arith.cmpf oge, %20, %34 : vector<1x8xf32>
    %36 = arith.extui %35 : vector<1x8xi1> to vector<1x8xi32>
    %37 = arith.addi %33, %36 : vector<1x8xi32>
    %cst_25 = arith.constant 8.000000e-01 : f32
    %38 = vector.broadcast %cst_25 : f32 to vector<1x8xf32>
    %39 = arith.cmpf oge, %20, %38 : vector<1x8xf32>
    %40 = arith.extui %39 : vector<1x8xi1> to vector<1x8xi32>
    %41 = arith.addi %37, %40 : vector<1x8xi32>
    %cst_26 = arith.constant 1.000000e+00 : f32
    %42 = vector.broadcast %cst_26 : f32 to vector<1x8xf32>
    %43 = arith.cmpf oge, %20, %42 : vector<1x8xf32>
    %44 = arith.extui %43 : vector<1x8xi1> to vector<1x8xi32>
    %45 = arith.addi %41, %44 : vector<1x8xi32>
    %c1_i32 = arith.constant 1 : i32
    %46 = vector.broadcast %c1_i32 : i32 to vector<1x8xi32>
    %47 = arith.subi %45, %46 : vector<1x8xi32>
    %c0_27 = arith.constant 0 : index
    %c0_28 = arith.constant 0 : index
    %48 = vector.load %arg6[%c0_27, %c0_28] : memref<1x8xi32, #tpu.memory_space<vmem>>, vector<1x8xi32>
    tpu.vector_store %arg6[%c0_27, %c0_28], %47 {strides = array<i32>} : memref<1x8xi32, #tpu.memory_space<vmem>>, vector<1x8xi32>,
    return
  }
  func.func @transform_0(%arg0: i32) -> (i32, i32, i32) {
    %c0_i32 = arith.constant 0 : i32
    %c0_i32_0 = arith.constant 0 : i32
    %c0_i32_1 = arith.constant 0 : i32
    return %arg0, %c0_i32, %c0_i32_0 : i32, i32, i32
  }
  func.func @transform_1(%arg0: i32) -> (i32, i32) {
    %c0_i32 = arith.constant 0 : i32
    %c0_i32_0 = arith.constant 0 : i32
    %c0_i32_1 = arith.constant 0 : i32
    return %c0_i32, %c0_i32_0 : i32, i32
  }
  func.func @transform_2(%arg0: i32) -> (i32, i32) {
    %c0_i32 = arith.constant 0 : i32
    %c0_i32_0 = arith.constant 0 : i32
    %c0_i32_1 = arith.constant 0 : i32
    return %c0_i32, %c0_i32_0 : i32, i32
  }
  func.func @transform_3(%arg0: i32) -> (i32, i32) {
    %c0_i32 = arith.constant 0 : i32
    %c0_i32_0 = arith.constant 0 : i32
    %c0_i32_1 = arith.constant 0 : i32
    return %c0_i32, %c0_i32_0 : i32, i32
  }
  func.func @transform_4(%arg0: i32) -> (i32, i32, i32, i32) {
    %c0_i32 = arith.constant 0 : i32
    %c0_i32_0 = arith.constant 0 : i32
    %c0_i32_1 = arith.constant 0 : i32
    %c0_i32_2 = arith.constant 0 : i32
    return %arg0, %c0_i32, %c0_i32_0, %c0_i32_1 : i32, i32, i32, i32
  }
  func.func @transform_5(%arg0: i32) -> (i32, i32) {
    %c0_i32 = arith.constant 0 : i32
    %c0_i32_0 = arith.constant 0 : i32
    %c0_i32_1 = arith.constant 0 : i32
    return %c0_i32, %c0_i32_0 : i32, i32
  }
}

</mosaic_0001>

<bundles_post_ra>
// kernel: preprocessing_pipeline.1
= control target key start
LH: loop header
LB: loop body
LE: loop exit
PB: predicated region body
PF: predicated region fallthrough
CT: control target
= control target key end

     0   :  { %s2962_s0 = inlined_call_operand.hbm [shape: f32[2,48,16], index: 0, kind: input, shape index: {}]   ;;  %s2963_s1 = inlined_call_operand.hbm [shape: f32[224,16], index: 1, kind: input, shape index: {}]   ;;  %s2964_s2 = inlined_call_operand.hbm [shape: f32[16,224], index: 2, kind: input, shape index: {}]   ;;  %s2965_s3 = inlined_call_operand.hbm [shape: f32[1,8], index: 3, kind: input, shape index: {}]   ;;  %s2966_s4 = inlined_call_operand.hbm [shape: f32[2,3,224,224], index: 4, kind: output, shape index: {0}]   ;;  %s2967_s5 = inlined_call_operand.hbm [shape: s32[1,8], index: 5, kind: output, shape index: {1}]  }
   0x1   :  { %2971 = sst [smem:[#allocation18_spill]] %s2963_s1 }
   0x2   :  { %11 = vsyncpa [#allocation3], 0 }
   0x3   :  { %13 = vsyncpa [#allocation3 + $0x1], 0 }
   0x4   :  { %14 = vsyncpa [#allocation6], 0 }
   0x5   :  { %15 = vsyncpa [#allocation9], 0 }
   0x6   :  { %16 = vsyncpa [#allocation4], 0 }
   0x7   :  { %18 = vsyncpa [#allocation4 + $0x1], 0 }
   0x8   :  { %19 = vsyncpa [#allocation12], 0  ;;  %s2121_s18 = smov 0   ;;  %s2123_s19 = smov 0  }
   0x9   :  { %s2125_s20 = smov 0   ;;  %s2127_s21 = smov 0  }
   0xa LB: > { %s2142_s22 = sadd.s32 4294967295, %s2078_s21   ;;  %s1443_s23 = sadd.s32 4294967294, %s2078_s21   ;;  %s2078_s21 = sphi %s2127_s21, %s2988_s21   ;;  %s2074_s20 = sphi %s2125_s20, %s2987_s20   ;;  %s2070_s19 = sphi %s2123_s19, %s2986_s19   ;;  %s2066_s18 = sphi %s2121_s18, %s2985_s18  }
   0xb   : > { %p45_p0 = scmp.ne.s32.totalorder %s2070_s19, %s2066_s18  ;;  %p46_p1 = scmp.eq.s32.totalorder %s2142_s22, 0 }
   0xc   : > { %p2970_p2 = scmp.eq.s32.totalorder %s2142_s22, 1  ;;  %p138_p3 = scmp.eq.s32.totalorder %s1443_s23, 1 }
   0xd   : > { %p2151_p4 = por %p46_p1, %p45_p0  ;;  %p1444_p5 = scmp.ge.s32.totalorder %s2078_s21, 1 }
   0xe   : > { %p2156_p6 = por %p138_p3, %p45_p0  ;;  %p166_p7 = scmp.lt.s32.totalorder %s2078_s21, 3 }
   0xf   : > { %s2974_s1 = sld [smem:[#allocation18_spill]]  ;;  %s2080_s30 = smov [#allocation5]  }
  0x10   : > { %p2164_p8 = pnand %p1444_p5, %p166_p7  ;;  %s179_s6 = sshll.u32 %s2080_s30, 4  ;;  %s180_s6 = int_to_ptr.vmem [resolvable:$true] %s179_s6 }
  0x11   : > { %s191_s10 = sshll.u32 %s2964_s2, 4  ;;  %s2968_s11 = smov 128   ;;  %s192_s10 = int_to_ptr.hbm [resolvable:$true] %s191_s10 }
  0x12   : > { %p1781_p9 = pneg %p2164_p8  ;;  %s2969_s12 = smov 8  }
  0x13   : > { %s2083_s13 = smov [#allocation7]   ;;  %s2084_s15 = smov 256  }
  0x14   : > { %p2172_p10 = pnand %p1781_p9, %p46_p1  ;;  %s193_s14 = sshll.u32 %s2083_s13, 4  ;;  %s194_s14 = int_to_ptr.vmem [resolvable:$true] %s193_s14 }
  0x15   : > { %s177_s28 = sshll.u32 %s2974_s1, 4  ;;  %s2085_s16 = smov 16   ;;  %s178_s28 = int_to_ptr.hbm [resolvable:$true] %s177_s28 }
  0x16   : > { %1784 = dma.hbm_to_vmem [thread:$0]  (!%p2172_p10), %s178_s28, 3584, %s180_s6, [#allocation6], %s2968_s11, %s2968_s11, %s2969_s12  }
  0x17   : > { %1787 = dma.hbm_to_vmem [thread:$0]  (!%p2172_p10), %s192_s10, 512, %s194_s14, [#allocation6], %s2084_s15, %s2084_s15, %s2085_s16  }
  0x18   : > { %s206_s26 = sshll.u32 %s2965_s3, 4  ;;  %s2086_s27 = smov [#allocation8]   ;;  %s207_s26 = int_to_ptr.hbm [resolvable:$true] %s206_s26 }
  0x19   : > { %s208_s28 = sshll.u32 %s2086_s27, 4  ;;  %s2193_s30 = sadd.s32 1, %s2078_s21   ;;  %s209_s28 = int_to_ptr.vmem [resolvable:$true] %s208_s28 }
  0x1a   : > { %1790 = dma.hbm_to_vmem [thread:$0]  (!%p2172_p10), %s207_s26, 16, %s209_s28, [#allocation9]  }
  0x1b   : > { %s29_s6 = ssub.s32 %s2078_s21, %s2193_s30  ;;  %s32_s8 = sadd.s32 1, %s2074_s20 }
  0x1c   : > { %p30_p12 = scmp.eq.s32.totalorder %s29_s6, 0  ;;  %p39_p13 = scmp.ne.s32.totalorder %s2074_s20, %s2070_s19 }
  0x1d   : > { %p40_p0 = scmp.eq.s32.totalorder %s2078_s21, 0  ;;  %p1802_p3 = scmp.lt.s32.totalorder %s2078_s21, 2 }
  0x1e   : > { %s2203_s9 = scalar_select %p30_p12, %s2074_s20, %s32_s8  }
  0x1f   : > { %p41_p5 = por %p40_p0, %p39_p13  ;;  %p2207_p7 = por %p2970_p2, %p39_p13 }
  0x20   : > { %s219_s13 = sand.u32 1, %s2074_s20   ;;  %s1757_s7 = smul.u32 48, %s2078_s21 }
  0x21   : > { %s1756_s14 = smul.u32 48, %s219_s13  ;;  %p2216_p9 = pnand %p1802_p3, %p41_p5 }
  0x22   : > { %s228_s17 = scalar_lea.hbm %s2962_s0, %s1757_s7  ;;  %s220_s6 = scalar_lea.sflag [#allocation3], %s219_s13 }
  0x23   : > { %s229_s26 = sshll.u32 %s228_s17, 4  ;;  %s223_s27 = scalar_lea.vmem [#allocation2], %s1756_s14  ;;  %s230_s26 = int_to_ptr.hbm [resolvable:$true] %s229_s26 }
  0x24   : > { %s231_s28 = sshll.u32 %s223_s27, 4  ;;  %s1942_s8 = sshra.s32 %s230_s26, 4  ;;  %s232_s28 = int_to_ptr.vmem [resolvable:$true] %s231_s28  ;;  %s1943_s8 = int_to_ptr.hbm [resolvable:$true] %s1942_s8 }
  0x25   : > { %s1944_s11 = scalar_lea.hbm %s1943_s8, 48  ;;  %p1946_p12 = pneg %p2216_p9 }
  0x26   : > { %p1945_p10 = scmp.ne.s32.totalorder %s1943_s8, %s1944_s11  ;;  %s1949_s16 = scalar_lea.hbm %s2962_s0, 96 }
  0x27   : > { %p1950_p3 = scmp.lt.s32.totalorder %s1943_s8, %s2962_s0  ;;  %p1951_p5 = scmp.lt.s32.totalorder %s1949_s16, %s1944_s11 }
  0x28   : > { %p1947_p13 = pnand %p1946_p12, %p1945_p10 }
  0x29   : > { %p1952_p11 = por %p1951_p5, %p1950_p3 }
  0x2a   : > { %p1948_p0 = pneg %p1947_p13 }
  0x2c   : > { %p1953_p2 = pnand %p1952_p11, %p1948_p0 }
  0x2e   : > { %1956 = shalt.err (!%p1953_p2)
}
  0x2f   : > { %s2979_s13 = smov 8   ;;  %s2980_s14 = smov 128  }
  0x30   : > { %1794 = dma.hbm_to_vmem [thread:$0]  (!%p2216_p9), %s230_s26, 768, %s232_s28, %s220_s6, %s2980_s14, %s2980_s14, %s2979_s13  }
  0x31   : > { %243 = sbr.rel (%p2164_p8) target bundleno = 694 (0x2b6), region = 36  ;;  %s2236_s17 = sand.u32 (!%p2164_p8), 1, %s2070_s19  }
  0x32   : > { %s1758_s1 = smul.u32 (!%p2164_p8), 48, %s2236_s17  ;;  %s246_s11 = scalar_lea.sflag (!%p2164_p8), [#allocation3], %s2236_s17 }
  0x34   : > { %s2240_s12 = scalar_lea.vmem (!%p2164_p8), [#allocation2], %s1758_s1 }
  0x36   : > { %2045 = dma.done.wait (%p2151_p4), %s246_s11, 768  }
  0x37   : > { %2047 = vsyncadd (%p2151_p4), %s246_s11, 4294966528 }
  0x38   : > { %2049 = dma.done.wait (%p46_p1), [#allocation6], 4096  }
  0x39   : > { %2051 = vsyncadd (%p46_p1), [#allocation6], 4294963200 }
  0x3a   : > { %2053 = dma.done.wait (%p46_p1), [#allocation9], 16  }
  0x3b   : > { %2055 = vsyncadd (%p46_p1), [#allocation9], 4294967280  ;;  %v322_v0 = vld [vmem:[#allocation7 + $0x10] sm:$0xff]  ;;  %v323_v1 = vld [vmem:[#allocation7 + $0x18] sm:$0xff]  ;;  %vm330_vm0 = vcmask 130048   ;;  %s1759_s24 = smul.u32 1344, %s2236_s17 }
  0x3c   : > { %v320_v2 = vld [vmem:[#allocation7] sm:$0xff]  ;;  %363 = vmatpush.msra.mxu0 %v322_v0  ;;  %398 = vmatpush.msra.mxu1 %v323_v1  ;;  %v321_v3 = vld [vmem:[#allocation7 + $0x8] sm:$0xff]  ;;  %v2272_v14 = vld [vmem:[#allocation5 + $0x58] sm:$0xff]  ;;  %vm706_vm1 = vcmask 785408   ;;  %s2088_s23 = smov [#allocation11]   ;;  %s1331_s6 = sshll.u32 %s2967_s5, 4  ;;  %s1332_s6 = int_to_ptr.hbm [resolvable:$true] %s1331_s6 }
  0x3d   : > { %v324_v4 = vld [vmem:[%s2240_s12] sm:$0xff]  ;;  %v325_v5 = vld [vmem:[%s2240_s12 + $0x8] sm:$0xff]  ;;  %v326_v6 = vld [vmem:[%s2240_s12 + $0x10] sm:$0xff]  ;;  %s2453_s29 = scalar_lea.vmem [#allocation10], %s1759_s24  ;;  %s1329_s26 = sshll.u32 %s2088_s23, 4  ;;  %vm1299_vm8 = vcmask 57344   ;;  %s1330_s26 = int_to_ptr.vmem [resolvable:$true] %s1329_s26 }
  0x3e   : > { %364 = vmatpush.msra.mxu0 %v320_v2  ;;  %399 = vmatpush.msra.mxu1 %v321_v3  ;;  %v327_v7 = vld [vmem:[%s2240_s12 + $0x18] sm:$0xff]  ;;  %v328_v8 = vld [vmem:[%s2240_s12 + $0x20] sm:$0xff]  ;;  %v329_v9 = vld [vmem:[%s2240_s12 + $0x28] sm:$0xff]  ;;  %p2981_p1 = scmp.eq.s32.totalorder %s2142_s22, 1  ;;  %s1760_s8 = smul.u32 1344, %s2142_s22 }
  0x3f   : > { %1454 = vmatmul.msk.f32.vlgmr.msra.gmra.mxu0 %vm330_vm0, %v324_v4  ;;  %1460 = vmatmul.msk.f32.vlgmr.msra.gmra.mxu1 %vm330_vm0, %v324_v4  ;;  %v2278_v17 = vld [vmem:[#allocation5 + $0x60] sm:$0xff]  ;;  %v2284_v20 = vld [vmem:[#allocation5 + $0x68] sm:$0xff]  ;;  %v2296_v24 = vld [vmem:[#allocation5 + $0x70] sm:$0xff]  ;;  %s1314_s13 = sshll.u32 %s2453_s29, 4  ;;  %s1302_s1 = scalar_lea.sflag [#allocation4], %s2236_s17  ;;  %s1315_s13 = int_to_ptr.vmem [resolvable:$true] %s1314_s13 }
  0x40   : > { %v2290_v21 = vld [vmem:[#allocation5] sm:$0xff]  ;;  %v2302_v25 = vld [vmem:[#allocation5 + $0x8] sm:$0xff]  ;;  %v2308_v28 = vld [vmem:[#allocation5 + $0x78] sm:$0xff]  ;;  %s1313_s16 = scalar_lea.hbm %s2966_s4, %s1760_s8 }
  0x41   : > { %v2314_v29 = vld [vmem:[#allocation5 + $0x10] sm:$0xff]  ;;  %v2320_v30 = vld [vmem:[#allocation5 + $0x80] sm:$0xff]  ;;  %v2326_v31 = vld [vmem:[#allocation5 + $0x18] sm:$0xff]  ;;  %s1316_s14 = sshll.u32 %s1313_s16, 4  ;;  %s1317_s14 = int_to_ptr.hbm [resolvable:$true] %s1316_s14 }
  0x42   : > { %v2332_v32 = vld [vmem:[#allocation5 + $0x88] sm:$0xff]  ;;  %v2338_v33 = vld [vmem:[#allocation5 + $0x20] sm:$0xff]  ;;  %v2344_v34 = vld [vmem:[#allocation5 + $0x90] sm:$0xff]  ;;  %s2014_s11 = sshra.s32 %s1317_s14, 4  ;;  %s2015_s11 = int_to_ptr.hbm [resolvable:$true] %s2014_s11 }
  0x43   : > { %v2350_v35 = vld [vmem:[#allocation5 + $0x28] sm:$0xff]  ;;  %v2356_v36 = vld [vmem:[#allocation5 + $0x98] sm:$0xff]  ;;  %v2362_v37 = vld [vmem:[#allocation5 + $0x30] sm:$0xff]  ;;  %s2016_s12 = scalar_lea.hbm %s2015_s11, 1344  ;;  %p2021_p11 = scmp.lt.s32.totalorder %s2015_s11, %s2966_s4 }
  0x44   : > { %v2368_v38 = vld [vmem:[#allocation5 + $0xa0] sm:$0xff]  ;;  %v2374_v39 = vld [vmem:[#allocation5 + $0x38] sm:$0xff]  ;;  %v2380_v40 = vld [vmem:[#allocation5 + $0xa8] sm:$0xff]  ;;  %p2017_p2 = scmp.ne.s32.totalorder %s2015_s11, %s2016_s12 }
  0x45   : > { %v2386_v41 = vld [vmem:[#allocation5 + $0x40] sm:$0xff]  ;;  %v2392_v42 = vld [vmem:[#allocation5 + $0xb0] sm:$0xff]  ;;  %v2398_v43 = vld [vmem:[#allocation5 + $0x48] sm:$0xff] }
  0x46   : > { %v2404_v44 = vld [vmem:[#allocation5 + $0xb8] sm:$0xff]  ;;  %v2410_v45 = vld [vmem:[#allocation5 + $0xc0] sm:$0xff]  ;;  %v2412_v46 = vld [vmem:[#allocation5 + $0x50] sm:$0xff]  ;;  %p2018_p4 = pnand %p2017_p2, %p2207_p7 }
  0x47   : > { %1455 = vmatmul.msk.f32.gmra.mxu0 %vm330_vm0, %v325_v5  ;;  %1461 = vmatmul.msk.f32.gmra.mxu1 %vm330_vm0, %v325_v5  ;;  %v2422_v47 = vld [vmem:[#allocation5 + $0xc8] sm:$0xff]  ;;  %v2432_v48 = vld [vmem:[#allocation5 + $0xd0] sm:$0xff]  ;;  %v2442_v49 = vld [vmem:[#allocation5 + $0xd8] sm:$0xff] }
  0x48   : > { %p2019_p8 = pneg %p2018_p4 }
  0x4f   : > { %1456 = vmatmul.msk.f32.gmra.mxu0 %vm330_vm0, %v326_v6  ;;  %1462 = vmatmul.msk.f32.gmra.mxu1 %vm330_vm0, %v326_v6 }
  0x57   : > { %1457 = vmatmul.msk.f32.gmra.mxu0 %vm330_vm0, %v327_v7  ;;  %1463 = vmatmul.msk.f32.gmra.mxu1 %vm330_vm0, %v327_v7 }
  0x5f   : > { %1458 = vmatmul.msk.f32.gmra.mxu0 %vm330_vm0, %v328_v8  ;;  %1464 = vmatmul.msk.f32.gmra.mxu1 %vm330_vm0, %v328_v8 }
  0x67   : > { %1459 = vmatmul.msk.f32.gmra.mxu0 %vm330_vm0, %v329_v9  ;;  %1465 = vmatmul.msk.f32.gmra.mxu1 %vm330_vm0, %v329_v9 }
  0xbc   : > { %v366_v10 = vpop.f32.mrf.mxu0  ;;  %v401_v11 = vpop.f32.mrf.mxu1 }
  0xc4   : > { %v369_v12 = vpop.f32.mrf.mxu0  ;;  %v404_v13 = vpop.f32.mrf.mxu1 }
  0xc5   : > { %517 = vmatpush.msrb.mxu0 %v369_v12  ;;  %1752 = vmatpush.msra.mxu2 %v369_v12 }
  0xc6   : > { %618 = vmatpush.msrb.mxu1 %v404_v13  ;;  %1754 = vmatpush.msra.mxu3 %v404_v13 }
  0xc7   : > { %518 = vmatpush.msrb.mxu0 %v366_v10  ;;  %1753 = vmatpush.msra.mxu2 %v366_v10 }
  0xc8   : > { %619 = vmatpush.msrb.mxu1 %v401_v11  ;;  %1755 = vmatpush.msra.mxu3 %v401_v11 }
  0xc9   : > { %1477 = vmatmul.msk.f32.vlgmr.msra.gmra.mxu2 %vm330_vm0, %v2272_v14  ;;  %1505 = vmatmul.msk.f32.vlgmr.msra.gmra.mxu3 %vm330_vm0, %v2272_v14 }
  0xca   : > { %1466 = vmatmul.msk.f32.vlgmr.msrb.gmra.mxu0 %vm330_vm0, %v2290_v21  ;;  %1494 = vmatmul.msk.f32.vlgmr.msrb.gmra.mxu1 %vm330_vm0, %v2290_v21 }
  0xcc   : > { %v372_v15 = vpop.f32.mrf.mxu0  ;;  %v407_v16 = vpop.f32.mrf.mxu1 }
  0xd1   : > { %1478 = vmatmul.msk.f32.gmra.mxu2 %vm330_vm0, %v2278_v17  ;;  %1506 = vmatmul.msk.f32.gmra.mxu3 %vm330_vm0, %v2278_v17 }
  0xd2   : > { %1467 = vmatmul.msk.f32.gmra.mxu0 %vm330_vm0, %v2302_v25  ;;  %1495 = vmatmul.msk.f32.gmra.mxu1 %vm330_vm0, %v2302_v25 }
  0xd4   : > { %v375_v18 = vpop.f32.mrf.mxu0  ;;  %v410_v19 = vpop.f32.mrf.mxu1 }
  0xd5   : > { %776 = vmatpush.msra.mxu0 %v375_v18  ;;  %877 = vmatpush.msra.mxu1 %v410_v19 }
  0xd7   : > { %777 = vmatpush.msra.mxu0 %v372_v15  ;;  %878 = vmatpush.msra.mxu1 %v407_v16 }
  0xd9   : > { %1479 = vmatmul.msk.f32.gmra.mxu2 %vm330_vm0, %v2284_v20  ;;  %1507 = vmatmul.msk.f32.gmra.mxu3 %vm330_vm0, %v2284_v20 }
  0xda   : > { %1468 = vmatmul.msk.f32.gmra.mxu0 %vm330_vm0, %v2314_v29  ;;  %1496 = vmatmul.msk.f32.gmra.mxu1 %vm330_vm0, %v2314_v29 }
  0xdc   : > { %v378_v22 = vpop.f32.mrf.mxu0  ;;  %v413_v23 = vpop.f32.mrf.mxu1 }
  0xe1   : > { %1480 = vmatmul.msk.f32.gmra.mxu2 %vm330_vm0, %v2296_v24  ;;  %1508 = vmatmul.msk.f32.gmra.mxu3 %vm330_vm0, %v2296_v24 }
  0xe2   : > { %1469 = vmatmul.msk.f32.gmra.mxu0 %vm330_vm0, %v2326_v31  ;;  %1497 = vmatmul.msk.f32.gmra.mxu1 %vm330_vm0, %v2326_v31 }
  0xe4   : > { %v381_v26 = vpop.f32.mrf.mxu0  ;;  %v416_v27 = vpop.f32.mrf.mxu1 }
  0xe5   : > { %1035 = vmatpush.msrb.mxu2 %v381_v26  ;;  %1136 = vmatpush.msrb.mxu3 %v416_v27 }
  0xe7   : > { %1036 = vmatpush.msrb.mxu2 %v378_v22  ;;  %1137 = vmatpush.msrb.mxu3 %v413_v23 }
  0xe9   : > { %1481 = vmatmul.msk.f32.gmra.mxu2 %vm330_vm0, %v2308_v28  ;;  %1509 = vmatmul.msk.f32.gmra.mxu3 %vm330_vm0, %v2308_v28 }
  0xea   : > { %1470 = vmatmul.msk.f32.gmra.mxu0 %vm330_vm0, %v2338_v33  ;;  %1498 = vmatmul.msk.f32.gmra.mxu1 %vm330_vm0, %v2338_v33 }
  0xf1   : > { %1482 = vmatmul.msk.f32.gmra.mxu2 %vm330_vm0, %v2320_v30  ;;  %1510 = vmatmul.msk.f32.gmra.mxu3 %vm330_vm0, %v2320_v30 }
  0xf2   : > { %1471 = vmatmul.msk.f32.gmra.mxu0 %vm330_vm0, %v2350_v35  ;;  %1499 = vmatmul.msk.f32.gmra.mxu1 %vm330_vm0, %v2350_v35 }
  0xf9   : > { %1483 = vmatmul.msk.f32.gmra.mxu2 %vm330_vm0, %v2332_v32  ;;  %1511 = vmatmul.msk.f32.gmra.mxu3 %vm330_vm0, %v2332_v32 }
  0xfa   : > { %1472 = vmatmul.msk.f32.gmra.mxu0 %vm330_vm0, %v2362_v37  ;;  %1500 = vmatmul.msk.f32.gmra.mxu1 %vm330_vm0, %v2362_v37 }
 0x101   : > { %1484 = vmatmul.msk.f32.gmra.mxu2 %vm330_vm0, %v2344_v34  ;;  %1512 = vmatmul.msk.f32.gmra.mxu3 %vm330_vm0, %v2344_v34 }
 0x102   : > { %1473 = vmatmul.msk.f32.gmra.mxu0 %vm330_vm0, %v2374_v39  ;;  %1501 = vmatmul.msk.f32.gmra.mxu1 %vm330_vm0, %v2374_v39 }
 0x109   : > { %1485 = vmatmul.msk.f32.gmra.mxu2 %vm330_vm0, %v2356_v36  ;;  %1513 = vmatmul.msk.f32.gmra.mxu3 %vm330_vm0, %v2356_v36 }
 0x10a   : > { %1474 = vmatmul.msk.f32.gmra.mxu0 %vm330_vm0, %v2386_v41  ;;  %1502 = vmatmul.msk.f32.gmra.mxu1 %vm330_vm0, %v2386_v41 }
 0x111   : > { %1486 = vmatmul.msk.f32.gmra.mxu2 %vm330_vm0, %v2368_v38  ;;  %1514 = vmatmul.msk.f32.gmra.mxu3 %vm330_vm0, %v2368_v38 }
 0x112   : > { %1475 = vmatmul.msk.f32.gmra.mxu0 %vm330_vm0, %v2398_v43  ;;  %1503 = vmatmul.msk.f32.gmra.mxu1 %vm330_vm0, %v2398_v43 }
 0x119   : > { %1487 = vmatmul.msk.f32.gmra.mxu2 %vm330_vm0, %v2380_v40  ;;  %1515 = vmatmul.msk.f32.gmra.mxu3 %vm330_vm0, %v2380_v40 }
 0x11a   : > { %1476 = vmatmul.msk.f32.gmra.mxu0 %vm330_vm0, %v2412_v46  ;;  %1504 = vmatmul.msk.f32.gmra.mxu1 %vm330_vm0, %v2412_v46 }
 0x121   : > { %1488 = vmatmul.msk.f32.gmra.mxu2 %vm330_vm0, %v2392_v42  ;;  %1516 = vmatmul.msk.f32.gmra.mxu3 %vm330_vm0, %v2392_v42 }
 0x122   : > { %1522 = vmatmul.msk.f32.vlgmr.msra.gmra.mxu0 %vm330_vm0, %v2290_v21  ;;  %1550 = vmatmul.msk.f32.vlgmr.msra.gmra.mxu1 %vm330_vm0, %v2290_v21 }
 0x129   : > { %1489 = vmatmul.msk.f32.gmra.mxu2 %vm330_vm0, %v2404_v44  ;;  %1517 = vmatmul.msk.f32.gmra.mxu3 %vm330_vm0, %v2404_v44 }
 0x12a   : > { %1523 = vmatmul.msk.f32.gmra.mxu0 %vm330_vm0, %v2302_v25  ;;  %1551 = vmatmul.msk.f32.gmra.mxu1 %vm330_vm0, %v2302_v25 }
 0x131   : > { %1490 = vmatmul.msk.f32.gmra.mxu2 %vm330_vm0, %v2410_v45  ;;  %1518 = vmatmul.msk.f32.gmra.mxu3 %vm330_vm0, %v2410_v45 }
 0x132   : > { %1524 = vmatmul.msk.f32.gmra.mxu0 %vm330_vm0, %v2314_v29  ;;  %1552 = vmatmul.msk.f32.gmra.mxu1 %vm330_vm0, %v2314_v29 }
 0x139   : > { %1491 = vmatmul.msk.f32.gmra.mxu2 %vm330_vm0, %v2422_v47  ;;  %1519 = vmatmul.msk.f32.gmra.mxu3 %vm330_vm0, %v2422_v47 }
 0x13a   : > { %1525 = vmatmul.msk.f32.gmra.mxu0 %vm330_vm0, %v2326_v31  ;;  %1553 = vmatmul.msk.f32.gmra.mxu1 %vm330_vm0, %v2326_v31 }
 0x141   : > { %1492 = vmatmul.msk.f32.gmra.mxu2 %vm330_vm0, %v2432_v48  ;;  %1520 = vmatmul.msk.f32.gmra.mxu3 %vm330_vm0, %v2432_v48 }
 0x142   : > { %1526 = vmatmul.msk.f32.gmra.mxu0 %vm330_vm0, %v2338_v33  ;;  %1554 = vmatmul.msk.f32.gmra.mxu1 %vm330_vm0, %v2338_v33 }
 0x147   : > { %v520_v54 = vpop.f32.mrf.mxu0  ;;  %v621_v57 = vpop.f32.mrf.mxu1 }
 0x148   : > { %705 = vst [vmem:[%s2453_s29] sm:$0xff] %v520_v54 }
 0x149   : > { %1493 = vmatmul.msk.f32.gmra.mxu2 %vm330_vm0, %v2442_v49  ;;  %1521 = vmatmul.msk.f32.gmra.mxu3 %vm330_vm0, %v2442_v49  ;;  %707 = vst.msk [vmem:[%s2453_s29 + $0x8] sm:$0xff] %vm706_vm1, %v621_v57 }
 0x14a   : > { %1527 = vmatmul.msk.f32.gmra.mxu0 %vm330_vm0, %v2350_v35  ;;  %1555 = vmatmul.msk.f32.gmra.mxu1 %vm330_vm0, %v2350_v35 }
 0x14c   : > { %v553_v50 = vpop.f32.mrf.mxu2  ;;  %v654_v51 = vpop.f32.mrf.mxu3 }
 0x14d   : > { %728 = vst [vmem:[%s2453_s29 + $0xb0] sm:$0xff] %v553_v50 }
 0x14e   : > { %729 = vst.msk [vmem:[%s2453_s29 + $0xb8] sm:$0xff] %vm706_vm1, %v654_v51 }
 0x14f   : > { %v523_v58 = vpop.f32.mrf.mxu0  ;;  %v624_v61 = vpop.f32.mrf.mxu1 }
 0x150   : > { %708 = vst [vmem:[%s2453_s29 + $0x10] sm:$0xff] %v523_v58 }
 0x151   : > { %1634 = vmatmul.msk.f32.vlgmr.msrb.gmra.mxu2 %vm330_vm0, %v2290_v21  ;;  %1662 = vmatmul.msk.f32.vlgmr.msrb.gmra.mxu3 %vm330_vm0, %v2290_v21  ;;  %709 = vst.msk [vmem:[%s2453_s29 + $0x18] sm:$0xff] %vm706_vm1, %v624_v61 }
 0x152   : > { %1528 = vmatmul.msk.f32.gmra.mxu0 %vm330_vm0, %v2362_v37  ;;  %1556 = vmatmul.msk.f32.gmra.mxu1 %vm330_vm0, %v2362_v37 }
 0x154   : > { %v556_v52 = vpop.f32.mrf.mxu2  ;;  %v657_v53 = vpop.f32.mrf.mxu3 }
 0x155   : > { %730 = vst [vmem:[%s2453_s29 + $0xc0] sm:$0xff] %v556_v52 }
 0x156   : > { %731 = vst.msk [vmem:[%s2453_s29 + $0xc8] sm:$0xff] %vm706_vm1, %v657_v53 }
 0x157   : > { %v526_v62 = vpop.f32.mrf.mxu0  ;;  %v627_v1 = vpop.f32.mrf.mxu1 }
 0x158   : > { %710 = vst [vmem:[%s2453_s29 + $0x20] sm:$0xff] %v526_v62 }
 0x159   : > { %1635 = vmatmul.msk.f32.gmra.mxu2 %vm330_vm0, %v2302_v25  ;;  %1663 = vmatmul.msk.f32.gmra.mxu3 %vm330_vm0, %v2302_v25  ;;  %711 = vst.msk [vmem:[%s2453_s29 + $0x28] sm:$0xff] %vm706_vm1, %v627_v1 }
 0x15a   : > { %1529 = vmatmul.msk.f32.gmra.mxu0 %vm330_vm0, %v2374_v39  ;;  %1557 = vmatmul.msk.f32.gmra.mxu1 %vm330_vm0, %v2374_v39 }
 0x15c   : > { %v559_v55 = vpop.f32.mrf.mxu2  ;;  %v660_v56 = vpop.f32.mrf.mxu3 }
 0x15d   : > { %732 = vst [vmem:[%s2453_s29 + $0xd0] sm:$0xff] %v559_v55 }
 0x15e   : > { %733 = vst.msk [vmem:[%s2453_s29 + $0xd8] sm:$0xff] %vm706_vm1, %v660_v56 }
 0x15f   : > { %v529_v2 = vpop.f32.mrf.mxu0  ;;  %v630_v5 = vpop.f32.mrf.mxu1 }
 0x160   : > { %712 = vst [vmem:[%s2453_s29 + $0x30] sm:$0xff] %v529_v2 }
 0x161   : > { %1636 = vmatmul.msk.f32.gmra.mxu2 %vm330_vm0, %v2314_v29  ;;  %1664 = vmatmul.msk.f32.gmra.mxu3 %vm330_vm0, %v2314_v29  ;;  %713 = vst.msk [vmem:[%s2453_s29 + $0x38] sm:$0xff] %vm706_vm1, %v630_v5 }
 0x162   : > { %1530 = vmatmul.msk.f32.gmra.mxu0 %vm330_vm0, %v2386_v41  ;;  %1558 = vmatmul.msk.f32.gmra.mxu1 %vm330_vm0, %v2386_v41 }
 0x164   : > { %v562_v59 = vpop.f32.mrf.mxu2  ;;  %v663_v60 = vpop.f32.mrf.mxu3 }
 0x165   : > { %734 = vst [vmem:[%s2453_s29 + $0xe0] sm:$0xff] %v562_v59 }
 0x166   : > { %735 = vst.msk [vmem:[%s2453_s29 + $0xe8] sm:$0xff] %vm706_vm1, %v663_v60 }
 0x167   : > { %v532_v6 = vpop.f32.mrf.mxu0  ;;  %v633_v9 = vpop.f32.mrf.mxu1 }
 0x168   : > { %714 = vst [vmem:[%s2453_s29 + $0x40] sm:$0xff] %v532_v6 }
 0x169   : > { %1637 = vmatmul.msk.f32.gmra.mxu2 %vm330_vm0, %v2326_v31  ;;  %1665 = vmatmul.msk.f32.gmra.mxu3 %vm330_vm0, %v2326_v31  ;;  %715 = vst.msk [vmem:[%s2453_s29 + $0x48] sm:$0xff] %vm706_vm1, %v633_v9 }
 0x16a   : > { %1531 = vmatmul.msk.f32.gmra.mxu0 %vm330_vm0, %v2398_v43  ;;  %1559 = vmatmul.msk.f32.gmra.mxu1 %vm330_vm0, %v2398_v43 }
 0x16c   : > { %v565_v63 = vpop.f32.mrf.mxu2  ;;  %v666_v0 = vpop.f32.mrf.mxu3 }
 0x16d   : > { %736 = vst [vmem:[%s2453_s29 + $0xf0] sm:$0xff] %v565_v63 }
 0x16e   : > { %737 = vst.msk [vmem:[%s2453_s29 + $0xf8] sm:$0xff] %vm706_vm1, %v666_v0 }
 0x16f   : > { %v535_v10 = vpop.f32.mrf.mxu0  ;;  %v636_v13 = vpop.f32.mrf.mxu1 }
 0x170   : > { %716 = vst [vmem:[%s2453_s29 + $0x50] sm:$0xff] %v535_v10 }
 0x171   : > { %1638 = vmatmul.msk.f32.gmra.mxu2 %vm330_vm0, %v2338_v33  ;;  %1666 = vmatmul.msk.f32.gmra.mxu3 %vm330_vm0, %v2338_v33  ;;  %717 = vst.msk [vmem:[%s2453_s29 + $0x58] sm:$0xff] %vm706_vm1, %v636_v13 }
 0x172   : > { %1532 = vmatmul.msk.f32.gmra.mxu0 %vm330_vm0, %v2412_v46  ;;  %1560 = vmatmul.msk.f32.gmra.mxu1 %vm330_vm0, %v2412_v46 }
 0x174   : > { %v568_v3 = vpop.f32.mrf.mxu2  ;;  %v669_v4 = vpop.f32.mrf.mxu3 }
 0x175   : > { %738 = vst [vmem:[%s2453_s29 + $0x100] sm:$0xff] %v568_v3 }
 0x176   : > { %739 = vst.msk [vmem:[%s2453_s29 + $0x108] sm:$0xff] %vm706_vm1, %v669_v4 }
 0x177   : > { %v538_v15 = vpop.f32.mrf.mxu0  ;;  %v639_v19 = vpop.f32.mrf.mxu1 }
 0x178   : > { %718 = vst [vmem:[%s2453_s29 + $0x60] sm:$0xff] %v538_v15 }
 0x179   : > { %1639 = vmatmul.msk.f32.gmra.mxu2 %vm330_vm0, %v2350_v35  ;;  %1667 = vmatmul.msk.f32.gmra.mxu3 %vm330_vm0, %v2350_v35  ;;  %719 = vst.msk [vmem:[%s2453_s29 + $0x68] sm:$0xff] %vm706_vm1, %v639_v19 }
 0x17a   : > { %1533 = vmatmul.msk.f32.gmra.mxu0 %vm330_vm0, %v2272_v14  ;;  %1561 = vmatmul.msk.f32.gmra.mxu1 %vm330_vm0, %v2272_v14 }
 0x17c   : > { %v571_v7 = vpop.f32.mrf.mxu2  ;;  %v672_v8 = vpop.f32.mrf.mxu3 }
 0x17d   : > { %740 = vst [vmem:[%s2453_s29 + $0x110] sm:$0xff] %v571_v7 }
 0x17e   : > { %741 = vst.msk [vmem:[%s2453_s29 + $0x118] sm:$0xff] %vm706_vm1, %v672_v8 }
 0x17f   : > { %v541_v21 = vpop.f32.mrf.mxu0  ;;  %v642_v25 = vpop.f32.mrf.mxu1 }
 0x180   : > { %720 = vst [vmem:[%s2453_s29 + $0x70] sm:$0xff] %v541_v21 }
 0x181   : > { %1640 = vmatmul.msk.f32.gmra.mxu2 %vm330_vm0, %v2362_v37  ;;  %1668 = vmatmul.msk.f32.gmra.mxu3 %vm330_vm0, %v2362_v37  ;;  %721 = vst.msk [vmem:[%s2453_s29 + $0x78] sm:$0xff] %vm706_vm1, %v642_v25 }
 0x182   : > { %1534 = vmatmul.msk.f32.gmra.mxu0 %vm330_vm0, %v2278_v17  ;;  %1562 = vmatmul.msk.f32.gmra.mxu1 %vm330_vm0, %v2278_v17 }
 0x184   : > { %v574_v11 = vpop.f32.mrf.mxu2  ;;  %v675_v12 = vpop.f32.mrf.mxu3 }
 0x185   : > { %742 = vst [vmem:[%s2453_s29 + $0x120] sm:$0xff] %v574_v11 }
 0x186   : > { %743 = vst.msk [vmem:[%s2453_s29 + $0x128] sm:$0xff] %vm706_vm1, %v675_v12 }
 0x187   : > { %v544_v26 = vpop.f32.mrf.mxu0  ;;  %v645_v31 = vpop.f32.mrf.mxu1 }
 0x188   : > { %722 = vst [vmem:[%s2453_s29 + $0x80] sm:$0xff] %v544_v26 }
 0x189   : > { %1641 = vmatmul.msk.f32.gmra.mxu2 %vm330_vm0, %v2374_v39  ;;  %1669 = vmatmul.msk.f32.gmra.mxu3 %vm330_vm0, %v2374_v39  ;;  %723 = vst.msk [vmem:[%s2453_s29 + $0x88] sm:$0xff] %vm706_vm1, %v645_v31 }
 0x18a   : > { %1535 = vmatmul.msk.f32.gmra.mxu0 %vm330_vm0, %v2284_v20  ;;  %1563 = vmatmul.msk.f32.gmra.mxu1 %vm330_vm0, %v2284_v20 }
 0x18c   : > { %v577_v16 = vpop.f32.mrf.mxu2  ;;  %v678_v18 = vpop.f32.mrf.mxu3 }
 0x18d   : > { %744 = vst [vmem:[%s2453_s29 + $0x130] sm:$0xff] %v577_v16 }
 0x18e   : > { %745 = vst.msk [vmem:[%s2453_s29 + $0x138] sm:$0xff] %vm706_vm1, %v678_v18 }
 0x18f   : > { %v547_v33 = vpop.f32.mrf.mxu0  ;;  %v648_v39 = vpop.f32.mrf.mxu1 }
 0x190   : > { %724 = vst [vmem:[%s2453_s29 + $0x90] sm:$0xff] %v547_v33 }
 0x191   : > { %1642 = vmatmul.msk.f32.gmra.mxu2 %vm330_vm0, %v2386_v41  ;;  %1670 = vmatmul.msk.f32.gmra.mxu3 %vm330_vm0, %v2386_v41  ;;  %725 = vst.msk [vmem:[%s2453_s29 + $0x98] sm:$0xff] %vm706_vm1, %v648_v39 }
 0x192   : > { %1536 = vmatmul.msk.f32.gmra.mxu0 %vm330_vm0, %v2296_v24  ;;  %1564 = vmatmul.msk.f32.gmra.mxu1 %vm330_vm0, %v2296_v24 }
 0x194   : > { %v580_v22 = vpop.f32.mrf.mxu2  ;;  %v681_v23 = vpop.f32.mrf.mxu3 }
 0x195   : > { %746 = vst [vmem:[%s2453_s29 + $0x140] sm:$0xff] %v580_v22 }
 0x196   : > { %747 = vst.msk [vmem:[%s2453_s29 + $0x148] sm:$0xff] %vm706_vm1, %v681_v23 }
 0x197   : > { %v651_v50 = vpop.f32.mrf.mxu1 }
 0x198   : > { %727 = vst.msk [vmem:[%s2453_s29 + $0xa8] sm:$0xff] %vm706_vm1, %v651_v50 }
 0x199   : > { %1643 = vmatmul.msk.f32.gmra.mxu2 %vm330_vm0, %v2398_v43  ;;  %1671 = vmatmul.msk.f32.gmra.mxu3 %vm330_vm0, %v2398_v43 }
 0x19a   : > { %1537 = vmatmul.msk.f32.gmra.mxu0 %vm330_vm0, %v2308_v28  ;;  %1565 = vmatmul.msk.f32.gmra.mxu1 %vm330_vm0, %v2308_v28 }
 0x19c   : > { %v583_v27 = vpop.f32.mrf.mxu2  ;;  %v684_v29 = vpop.f32.mrf.mxu3 }
 0x19d   : > { %748 = vst [vmem:[%s2453_s29 + $0x150] sm:$0xff] %v583_v27 }
 0x19e   : > { %749 = vst.msk [vmem:[%s2453_s29 + $0x158] sm:$0xff] %vm706_vm1, %v684_v29 }
 0x19f   : > { %v880_v53 = vpop.f32.mrf.mxu1 }
 0x1a0   : > { %1579 = vst.msk [vmem:[%s2453_s29 + $0x1c8] sm:$0xff] %vm706_vm1, %v880_v53 }
 0x1a1   : > { %1644 = vmatmul.msk.f32.gmra.mxu2 %vm330_vm0, %v2412_v46  ;;  %1672 = vmatmul.msk.f32.gmra.mxu3 %vm330_vm0, %v2412_v46  ;;  %v550_v46 = vpop.f32.mrf.mxu0 }
 0x1a2   : > { %726 = vst [vmem:[%s2453_s29 + $0xa0] sm:$0xff] %v550_v46  ;;  %1538 = vmatmul.msk.f32.gmra.mxu0 %vm330_vm0, %v2320_v30  ;;  %1566 = vmatmul.msk.f32.gmra.mxu1 %vm330_vm0, %v2320_v30 }
 0x1a4   : > { %v586_v35 = vpop.f32.mrf.mxu2  ;;  %v687_v37 = vpop.f32.mrf.mxu3 }
 0x1a5   : > { %750 = vst [vmem:[%s2453_s29 + $0x160] sm:$0xff] %v586_v35 }
 0x1a6   : > { %751 = vst.msk [vmem:[%s2453_s29 + $0x168] sm:$0xff] %vm706_vm1, %v687_v37 }
 0x1a7   : > { %v883_v56 = vpop.f32.mrf.mxu1 }
 0x1a8   : > { %1581 = vst.msk [vmem:[%s2453_s29 + $0x1d8] sm:$0xff] %vm706_vm1, %v883_v56 }
 0x1a9   : > { %1645 = vmatmul.msk.f32.gmra.mxu2 %vm330_vm0, %v2272_v14  ;;  %1673 = vmatmul.msk.f32.gmra.mxu3 %vm330_vm0, %v2272_v14  ;;  %v779_v52 = vpop.f32.mrf.mxu0 }
 0x1aa   : > { %1578 = vst [vmem:[%s2453_s29 + $0x1c0] sm:$0xff] %v779_v52  ;;  %1539 = vmatmul.msk.f32.gmra.mxu0 %vm330_vm0, %v2332_v32  ;;  %1567 = vmatmul.msk.f32.gmra.mxu1 %vm330_vm0, %v2332_v32 }
 0x1ac   : > { %v589_v41 = vpop.f32.mrf.mxu2  ;;  %v690_v43 = vpop.f32.mrf.mxu3 }
 0x1ad   : > { %752 = vst [vmem:[%s2453_s29 + $0x170] sm:$0xff] %v589_v41 }
 0x1ae   : > { %753 = vst.msk [vmem:[%s2453_s29 + $0x178] sm:$0xff] %vm706_vm1, %v690_v43 }
 0x1af   : > { %v886_v59 = vpop.f32.mrf.mxu1 }
 0x1b0   : > { %1583 = vst.msk [vmem:[%s2453_s29 + $0x1e8] sm:$0xff] %vm706_vm1, %v886_v59 }
 0x1b1   : > { %1646 = vmatmul.msk.f32.gmra.mxu2 %vm330_vm0, %v2278_v17  ;;  %1674 = vmatmul.msk.f32.gmra.mxu3 %vm330_vm0, %v2278_v17  ;;  %v782_v55 = vpop.f32.mrf.mxu0 }
 0x1b2   : > { %1580 = vst [vmem:[%s2453_s29 + $0x1d0] sm:$0xff] %v782_v55  ;;  %1540 = vmatmul.msk.f32.gmra.mxu0 %vm330_vm0, %v2344_v34  ;;  %1568 = vmatmul.msk.f32.gmra.mxu1 %vm330_vm0, %v2344_v34 }
 0x1b4   : > { %v592_v14 = vpop.f32.mrf.mxu2  ;;  %v693_v51 = vpop.f32.mrf.mxu3 }
 0x1b5   : > { %754 = vst [vmem:[%s2453_s29 + $0x180] sm:$0xff] %v592_v14 }
 0x1b6   : > { %755 = vst.msk [vmem:[%s2453_s29 + $0x188] sm:$0xff] %vm706_vm1, %v693_v51 }
 0x1b7   : > { %v889_v62 = vpop.f32.mrf.mxu1 }
 0x1b8   : > { %1585 = vst.msk [vmem:[%s2453_s29 + $0x1f8] sm:$0xff] %vm706_vm1, %v889_v62 }
 0x1b9   : > { %1647 = vmatmul.msk.f32.gmra.mxu2 %vm330_vm0, %v2284_v20  ;;  %1675 = vmatmul.msk.f32.gmra.mxu3 %vm330_vm0, %v2284_v20  ;;  %v785_v58 = vpop.f32.mrf.mxu0 }
 0x1ba   : > { %1582 = vst [vmem:[%s2453_s29 + $0x1e0] sm:$0xff] %v785_v58  ;;  %1541 = vmatmul.msk.f32.gmra.mxu0 %vm330_vm0, %v2356_v36  ;;  %1569 = vmatmul.msk.f32.gmra.mxu1 %vm330_vm0, %v2356_v36 }
 0x1bc   : > { %v595_v17 = vpop.f32.mrf.mxu2  ;;  %v696_v54 = vpop.f32.mrf.mxu3 }
 0x1bd   : > { %756 = vst [vmem:[%s2453_s29 + $0x190] sm:$0xff] %v595_v17 }
 0x1be   : > { %757 = vst.msk [vmem:[%s2453_s29 + $0x198] sm:$0xff] %vm706_vm1, %v696_v54 }
 0x1bf   : > { %v892_v1 = vpop.f32.mrf.mxu1 }
 0x1c0   : > { %1587 = vst.msk [vmem:[%s2453_s29 + $0x208] sm:$0xff] %vm706_vm1, %v892_v1 }
 0x1c1   : > { %1648 = vmatmul.msk.f32.gmra.mxu2 %vm330_vm0, %v2296_v24  ;;  %1676 = vmatmul.msk.f32.gmra.mxu3 %vm330_vm0, %v2296_v24  ;;  %v788_v61 = vpop.f32.mrf.mxu0 }
 0x1c2   : > { %1584 = vst [vmem:[%s2453_s29 + $0x1f0] sm:$0xff] %v788_v61  ;;  %1542 = vmatmul.msk.f32.gmra.mxu0 %vm330_vm0, %v2368_v38  ;;  %1570 = vmatmul.msk.f32.gmra.mxu1 %vm330_vm0, %v2368_v38 }
 0x1c4   : > { %v598_v20 = vpop.f32.mrf.mxu2  ;;  %v699_v57 = vpop.f32.mrf.mxu3 }
 0x1c5   : > { %758 = vst [vmem:[%s2453_s29 + $0x1a0] sm:$0xff] %v598_v20 }
 0x1c6   : > { %759 = vst.msk [vmem:[%s2453_s29 + $0x1a8] sm:$0xff] %vm706_vm1, %v699_v57 }
 0x1c7   : > { %v895_v4 = vpop.f32.mrf.mxu1 }
 0x1c8   : > { %1589 = vst.msk [vmem:[%s2453_s29 + $0x218] sm:$0xff] %vm706_vm1, %v895_v4 }
 0x1c9   : > { %1649 = vmatmul.msk.f32.gmra.mxu2 %vm330_vm0, %v2308_v28  ;;  %1677 = vmatmul.msk.f32.gmra.mxu3 %vm330_vm0, %v2308_v28  ;;  %v791_v0 = vpop.f32.mrf.mxu0 }
 0x1ca   : > { %1586 = vst [vmem:[%s2453_s29 + $0x200] sm:$0xff] %v791_v0  ;;  %1543 = vmatmul.msk.f32.gmra.mxu0 %vm330_vm0, %v2380_v40  ;;  %1571 = vmatmul.msk.f32.gmra.mxu1 %vm330_vm0, %v2380_v40 }
 0x1cc   : > { %v601_v24 = vpop.f32.mrf.mxu2  ;;  %v702_v60 = vpop.f32.mrf.mxu3 }
 0x1cd   : > { %760 = vst [vmem:[%s2453_s29 + $0x1b0] sm:$0xff] %v601_v24 }
 0x1ce   : > { %761 = vst.msk [vmem:[%s2453_s29 + $0x1b8] sm:$0xff] %vm706_vm1, %v702_v60 }
 0x1cf   : > { %v898_v7 = vpop.f32.mrf.mxu1 }
 0x1d0   : > { %1591 = vst.msk [vmem:[%s2453_s29 + $0x228] sm:$0xff] %vm706_vm1, %v898_v7 }
 0x1d1   : > { %1650 = vmatmul.msk.f32.gmra.mxu2 %vm330_vm0, %v2320_v30  ;;  %1678 = vmatmul.msk.f32.gmra.mxu3 %vm330_vm0, %v2320_v30  ;;  %v794_v3 = vpop.f32.mrf.mxu0 }
 0x1d2   : > { %1588 = vst [vmem:[%s2453_s29 + $0x210] sm:$0xff] %v794_v3  ;;  %1544 = vmatmul.msk.f32.gmra.mxu0 %vm330_vm0, %v2392_v42  ;;  %1572 = vmatmul.msk.f32.gmra.mxu1 %vm330_vm0, %v2392_v42 }
 0x1d4   : > { %v1038_v28 = vpop.f32.mrf.mxu2  ;;  %v1139_v63 = vpop.f32.mrf.mxu3 }
 0x1d5   : > { %1690 = vst [vmem:[%s2453_s29 + $0x380] sm:$0xff] %v1038_v28 }
 0x1d6   : > { %1691 = vst.msk [vmem:[%s2453_s29 + $0x388] sm:$0xff] %vm706_vm1, %v1139_v63 }
 0x1d7   : > { %v901_v10 = vpop.f32.mrf.mxu1 }
 0x1d8   : > { %1593 = vst.msk [vmem:[%s2453_s29 + $0x238] sm:$0xff] %vm706_vm1, %v901_v10 }
 0x1d9   : > { %1651 = vmatmul.msk.f32.gmra.mxu2 %vm330_vm0, %v2332_v32  ;;  %1679 = vmatmul.msk.f32.gmra.mxu3 %vm330_vm0, %v2332_v32  ;;  %v797_v6 = vpop.f32.mrf.mxu0 }
 0x1da   : > { %1590 = vst [vmem:[%s2453_s29 + $0x220] sm:$0xff] %v797_v6  ;;  %1545 = vmatmul.msk.f32.gmra.mxu0 %vm330_vm0, %v2404_v44  ;;  %1573 = vmatmul.msk.f32.gmra.mxu1 %vm330_vm0, %v2404_v44 }
 0x1dc   : > { %v1041_v30 = vpop.f32.mrf.mxu2  ;;  %v1142_v2 = vpop.f32.mrf.mxu3 }
 0x1dd   : > { %1692 = vst [vmem:[%s2453_s29 + $0x390] sm:$0xff] %v1041_v30 }
 0x1de   : > { %1693 = vst.msk [vmem:[%s2453_s29 + $0x398] sm:$0xff] %vm706_vm1, %v1142_v2 }
 0x1df   : > { %v904_v13 = vpop.f32.mrf.mxu1 }
 0x1e0   : > { %1595 = vst.msk [vmem:[%s2453_s29 + $0x248] sm:$0xff] %vm706_vm1, %v904_v13 }
 0x1e1   : > { %1652 = vmatmul.msk.f32.gmra.mxu2 %vm330_vm0, %v2344_v34  ;;  %1680 = vmatmul.msk.f32.gmra.mxu3 %vm330_vm0, %v2344_v34  ;;  %v800_v9 = vpop.f32.mrf.mxu0 }
 0x1e2   : > { %1592 = vst [vmem:[%s2453_s29 + $0x230] sm:$0xff] %v800_v9  ;;  %1546 = vmatmul.msk.f32.gmra.mxu0 %vm330_vm0, %v2410_v45  ;;  %1574 = vmatmul.msk.f32.gmra.mxu1 %vm330_vm0, %v2410_v45 }
 0x1e4   : > { %v1044_v32 = vpop.f32.mrf.mxu2  ;;  %v1145_v5 = vpop.f32.mrf.mxu3 }
 0x1e5   : > { %1694 = vst [vmem:[%s2453_s29 + $0x3a0] sm:$0xff] %v1044_v32 }
 0x1e6   : > { %1695 = vst.msk [vmem:[%s2453_s29 + $0x3a8] sm:$0xff] %vm706_vm1, %v1145_v5 }
 0x1e7   : > { %v907_v18 = vpop.f32.mrf.mxu1 }
 0x1e8   : > { %1597 = vst.msk [vmem:[%s2453_s29 + $0x258] sm:$0xff] %vm706_vm1, %v907_v18 }
 0x1e9   : > { %1653 = vmatmul.msk.f32.gmra.mxu2 %vm330_vm0, %v2356_v36  ;;  %1681 = vmatmul.msk.f32.gmra.mxu3 %vm330_vm0, %v2356_v36  ;;  %v803_v12 = vpop.f32.mrf.mxu0 }
 0x1ea   : > { %1594 = vst [vmem:[%s2453_s29 + $0x240] sm:$0xff] %v803_v12  ;;  %1547 = vmatmul.msk.f32.gmra.mxu0 %vm330_vm0, %v2422_v47  ;;  %1575 = vmatmul.msk.f32.gmra.mxu1 %vm330_vm0, %v2422_v47 }
 0x1ec   : > { %v1047_v34 = vpop.f32.mrf.mxu2  ;;  %v1148_v8 = vpop.f32.mrf.mxu3 }
 0x1ed   : > { %1696 = vst [vmem:[%s2453_s29 + $0x3b0] sm:$0xff] %v1047_v34 }
 0x1ee   : > { %1697 = vst.msk [vmem:[%s2453_s29 + $0x3b8] sm:$0xff] %vm706_vm1, %v1148_v8 }
 0x1ef   : > { %v910_v22 = vpop.f32.mrf.mxu1 }
 0x1f0   : > { %1599 = vst.msk [vmem:[%s2453_s29 + $0x268] sm:$0xff] %vm706_vm1, %v910_v22 }
 0x1f1   : > { %1654 = vmatmul.msk.f32.gmra.mxu2 %vm330_vm0, %v2368_v38  ;;  %1682 = vmatmul.msk.f32.gmra.mxu3 %vm330_vm0, %v2368_v38  ;;  %v806_v16 = vpop.f32.mrf.mxu0 }
 0x1f2   : > { %1596 = vst [vmem:[%s2453_s29 + $0x250] sm:$0xff] %v806_v16  ;;  %1548 = vmatmul.msk.f32.gmra.mxu0 %vm330_vm0, %v2432_v48  ;;  %1576 = vmatmul.msk.f32.gmra.mxu1 %vm330_vm0, %v2432_v48 }
 0x1f4   : > { %v1050_v36 = vpop.f32.mrf.mxu2  ;;  %v1151_v11 = vpop.f32.mrf.mxu3 }
 0x1f5   : > { %1698 = vst [vmem:[%s2453_s29 + $0x3c0] sm:$0xff] %v1050_v36 }
 0x1f6   : > { %1699 = vst.msk [vmem:[%s2453_s29 + $0x3c8] sm:$0xff] %vm706_vm1, %v1151_v11 }
 0x1f7   : > { %v913_v26 = vpop.f32.mrf.mxu1 }
 0x1f8   : > { %1601 = vst.msk [vmem:[%s2453_s29 + $0x278] sm:$0xff] %vm706_vm1, %v913_v26 }
 0x1f9   : > { %1655 = vmatmul.msk.f32.gmra.mxu2 %vm330_vm0, %v2380_v40  ;;  %1683 = vmatmul.msk.f32.gmra.mxu3 %vm330_vm0, %v2380_v40  ;;  %v809_v21 = vpop.f32.mrf.mxu0 }
 0x1fa   : > { %1598 = vst [vmem:[%s2453_s29 + $0x260] sm:$0xff] %v809_v21  ;;  %1549 = vmatmul.msk.f32.gmra.mxu0 %vm330_vm0, %v2442_v49  ;;  %1577 = vmatmul.msk.f32.gmra.mxu1 %vm330_vm0, %v2442_v49 }
 0x1fc   : > { %v1053_v38 = vpop.f32.mrf.mxu2  ;;  %v1154_v15 = vpop.f32.mrf.mxu3 }
 0x1fd   : > { %1700 = vst [vmem:[%s2453_s29 + $0x3d0] sm:$0xff] %v1053_v38 }
 0x1fe   : > { %1701 = vst.msk [vmem:[%s2453_s29 + $0x3d8] sm:$0xff] %vm706_vm1, %v1154_v15 }
 0x1ff   : > { %v916_v31 = vpop.f32.mrf.mxu1 }
 0x200   : > { %1603 = vst.msk [vmem:[%s2453_s29 + $0x288] sm:$0xff] %vm706_vm1, %v916_v31 }
 0x201   : > { %1656 = vmatmul.msk.f32.gmra.mxu2 %vm330_vm0, %v2392_v42  ;;  %1684 = vmatmul.msk.f32.gmra.mxu3 %vm330_vm0, %v2392_v42  ;;  %v812_v25 = vpop.f32.mrf.mxu0 }
 0x202   : > { %1600 = vst [vmem:[%s2453_s29 + $0x270] sm:$0xff] %v812_v25 }
 0x204   : > { %v1056_v40 = vpop.f32.mrf.mxu2  ;;  %v1157_v19 = vpop.f32.mrf.mxu3 }
 0x205   : > { %1702 = vst [vmem:[%s2453_s29 + $0x3e0] sm:$0xff] %v1056_v40  ;;  %v1280_v40 = vld [vmem:[#allocation8] sm:$0x1] }
 0x206   : > { %1703 = vst.msk [vmem:[%s2453_s29 + $0x3e8] sm:$0xff] %vm706_vm1, %v1157_v19  ;;  %vm1281_vm2 = vcmp.ge.f32.partialorder %v1280_v40, 0.0  ;;  %vm1283_vm3 = vcmp.ge.f32.partialorder %v1280_v40, 0.2  ;;  %v2087_v19 = vmov 0   ;;  %vm1295_vm7 = vcmp.ge.f32.partialorder %v1280_v40, 1.0 }
 0x207   : > { %v919_v37 = vpop.f32.mrf.mxu1  ;;  %v1282_v21 = vsel %vm1281_vm2, 1, %v2087_v19  ;;  %v1284_v22 = vsel %vm1283_vm3, 1, %v2087_v19  ;;  %vm1286_vm4 = vcmp.ge.f32.partialorder %v1280_v40, 0.4  ;;  %vm1289_vm5 = vcmp.ge.f32.partialorder %v1280_v40, 0.6 }
 0x208   : > { %1605 = vst.msk [vmem:[%s2453_s29 + $0x298] sm:$0xff] %vm706_vm1, %v919_v37  ;;  %v1290_v31 = vsel %vm1289_vm5, 1, %v2087_v19  ;;  %vm1292_vm6 = vcmp.ge.f32.partialorder %v1280_v40, 0.8  ;;  %v1296_v37 = vsel %vm1295_vm7, 1, %v2087_v19 }
 0x209   : > { %1657 = vmatmul.msk.f32.gmra.mxu2 %vm330_vm0, %v2404_v44  ;;  %1685 = vmatmul.msk.f32.gmra.mxu3 %vm330_vm0, %v2404_v44  ;;  %v815_v29 = vpop.f32.mrf.mxu0 }
 0x20a   : > { %1602 = vst [vmem:[%s2453_s29 + $0x280] sm:$0xff] %v815_v29 }
 0x20c   : > { %v1059_v42 = vpop.f32.mrf.mxu2  ;;  %v1160_v23 = vpop.f32.mrf.mxu3 }
 0x20d   : > { %1704 = vst [vmem:[%s2453_s29 + $0x3f0] sm:$0xff] %v1059_v42  ;;  %v1285_v42 = vadd.s32 %v1284_v22, %v1282_v21 }
 0x20e   : > { %1705 = vst.msk [vmem:[%s2453_s29 + $0x3f8] sm:$0xff] %vm706_vm1, %v1160_v23  ;;  %v1287_v23 = vsel %vm1286_vm4, 1, %v2087_v19 }
 0x20f   : > { %v922_v43 = vpop.f32.mrf.mxu1 }
 0x210   : > { %1607 = vst.msk [vmem:[%s2453_s29 + $0x2a8] sm:$0xff] %vm706_vm1, %v922_v43 }
 0x211   : > { %1658 = vmatmul.msk.f32.gmra.mxu2 %vm330_vm0, %v2410_v45  ;;  %1686 = vmatmul.msk.f32.gmra.mxu3 %vm330_vm0, %v2410_v45  ;;  %v818_v35 = vpop.f32.mrf.mxu0 }
 0x212   : > { %1604 = vst [vmem:[%s2453_s29 + $0x290] sm:$0xff] %v818_v35 }
 0x214   : > { %v1062_v44 = vpop.f32.mrf.mxu2  ;;  %v1163_v27 = vpop.f32.mrf.mxu3 }
 0x215   : > { %1706 = vst [vmem:[%s2453_s29 + $0x400] sm:$0xff] %v1062_v44  ;;  %v1288_v44 = vadd.s32 %v1287_v23, %v1285_v42 }
 0x216   : > { %1707 = vst.msk [vmem:[%s2453_s29 + $0x408] sm:$0xff] %vm706_vm1, %v1163_v27 }
 0x217   : > { %v925_v14 = vpop.f32.mrf.mxu1 }
 0x218   : > { %1609 = vst.msk [vmem:[%s2453_s29 + $0x2b8] sm:$0xff] %vm706_vm1, %v925_v14 }
 0x219   : > { %1659 = vmatmul.msk.f32.gmra.mxu2 %vm330_vm0, %v2422_v47  ;;  %1687 = vmatmul.msk.f32.gmra.mxu3 %vm330_vm0, %v2422_v47  ;;  %v821_v41 = vpop.f32.mrf.mxu0 }
 0x21a   : > { %1606 = vst [vmem:[%s2453_s29 + $0x2a0] sm:$0xff] %v821_v41 }
 0x21c   : > { %v1065_v45 = vpop.f32.mrf.mxu2  ;;  %v1166_v33 = vpop.f32.mrf.mxu3 }
 0x21d   : > { %1708 = vst [vmem:[%s2453_s29 + $0x410] sm:$0xff] %v1065_v45  ;;  %v1291_v45 = vadd.s32 %v1290_v31, %v1288_v44 }
 0x21e   : > { %1709 = vst.msk [vmem:[%s2453_s29 + $0x418] sm:$0xff] %vm706_vm1, %v1166_v33  ;;  %v1293_v33 = vsel %vm1292_vm6, 1, %v2087_v19 }
 0x21f   : > { %v928_v53 = vpop.f32.mrf.mxu1  ;;  %v1294_v35 = vadd.s32 %v1293_v33, %v1291_v45 }
 0x220   : > { %1611 = vst.msk [vmem:[%s2453_s29 + $0x2c8] sm:$0xff] %vm706_vm1, %v928_v53 }
 0x221   : > { %1660 = vmatmul.msk.f32.gmra.mxu2 %vm330_vm0, %v2432_v48  ;;  %1688 = vmatmul.msk.f32.gmra.mxu3 %vm330_vm0, %v2432_v48  ;;  %v824_v50 = vpop.f32.mrf.mxu0 }
 0x222   : > { %1608 = vst [vmem:[%s2453_s29 + $0x2b0] sm:$0xff] %v824_v50 }
 0x224   : > { %v1068_v47 = vpop.f32.mrf.mxu2  ;;  %v1169_v39 = vpop.f32.mrf.mxu3 }
 0x225   : > { %1710 = vst [vmem:[%s2453_s29 + $0x420] sm:$0xff] %v1068_v47  ;;  %v1297_v47 = vadd.s32 %v1296_v37, %v1294_v35 }
 0x226   : > { %1711 = vst.msk [vmem:[%s2453_s29 + $0x428] sm:$0xff] %vm706_vm1, %v1169_v39 }
 0x227   : > { %v931_v56 = vpop.f32.mrf.mxu1 }
 0x228   : > { %1613 = vst.msk [vmem:[%s2453_s29 + $0x2d8] sm:$0xff] %vm706_vm1, %v931_v56 }
 0x229   : > { %1661 = vmatmul.msk.f32.gmra.mxu2 %vm330_vm0, %v2442_v49  ;;  %1689 = vmatmul.msk.f32.gmra.mxu3 %vm330_vm0, %v2442_v49  ;;  %v827_v49 = vpop.f32.mrf.mxu0 }
 0x22a   : > { %1610 = vst [vmem:[%s2453_s29 + $0x2c0] sm:$0xff] %v827_v49 }
 0x22c   : > { %v1071_v48 = vpop.f32.mrf.mxu2  ;;  %v1172_v46 = vpop.f32.mrf.mxu3 }
 0x22d   : > { %1712 = vst [vmem:[%s2453_s29 + $0x430] sm:$0xff] %v1071_v48 }
 0x22e   : > { %1713 = vst.msk [vmem:[%s2453_s29 + $0x438] sm:$0xff] %vm706_vm1, %v1172_v46  ;;  %v1746_v46 = vadd.s32 4294967295, %v1297_v47 }
 0x22f   : > { %v934_v59 = vpop.f32.mrf.mxu1 }
 0x230   : > { %1615 = vst.msk [vmem:[%s2453_s29 + $0x2e8] sm:$0xff] %vm706_vm1, %v934_v59 }
 0x231   : > { %v830_v55 = vpop.f32.mrf.mxu0  ;;  %1300 = vst.msk [vmem:[#allocation11] sm:$0x1] %vm1299_vm8, %v1746_v46 }
 0x232   : > { %1612 = vst [vmem:[%s2453_s29 + $0x2d0] sm:$0xff] %v830_v55  ;;  %1777 = dma.vmem_to_hbm [thread:$0]  (%p2981_p1), %s1330_s26, 16, %s1332_s6, [#allocation12]  }
 0x233   : > { %s2020_s26 = scalar_lea.hbm %s2966_s4, 2688 }
 0x234   : > { %v1074_v51 = vpop.f32.mrf.mxu2  ;;  %v1175_v52 = vpop.f32.mrf.mxu3  ;;  %p2022_p9 = scmp.lt.s32.totalorder %s2020_s26, %s2016_s12 }
 0x235   : > { %1714 = vst [vmem:[%s2453_s29 + $0x440] sm:$0xff] %v1074_v51 }
 0x236   : > { %1715 = vst.msk [vmem:[%s2453_s29 + $0x448] sm:$0xff] %vm706_vm1, %v1175_v52  ;;  %p2023_p10 = por %p2022_p9, %p2021_p11 }
 0x237   : > { %v937_v62 = vpop.f32.mrf.mxu1 }
 0x238   : > { %1617 = vst.msk [vmem:[%s2453_s29 + $0x2f8] sm:$0xff] %vm706_vm1, %v937_v62  ;;  %p2024_p12 = pnand %p2023_p10, %p2019_p8 }
 0x239   : > { %v833_v58 = vpop.f32.mrf.mxu0 }
 0x23a   : > { %1614 = vst [vmem:[%s2453_s29 + $0x2e0] sm:$0xff] %v833_v58 }
 0x23c   : > { %v1077_v17 = vpop.f32.mrf.mxu2  ;;  %v1178_v54 = vpop.f32.mrf.mxu3 }
 0x23d   : > { %1716 = vst [vmem:[%s2453_s29 + $0x450] sm:$0xff] %v1077_v17 }
 0x23e   : > { %1717 = vst.msk [vmem:[%s2453_s29 + $0x458] sm:$0xff] %vm706_vm1, %v1178_v54 }
 0x23f   : > { %v940_v1 = vpop.f32.mrf.mxu1 }
 0x240   : > { %1619 = vst.msk [vmem:[%s2453_s29 + $0x308] sm:$0xff] %vm706_vm1, %v940_v1 }
 0x241   : > { %v836_v61 = vpop.f32.mrf.mxu0 }
 0x242   : > { %1616 = vst [vmem:[%s2453_s29 + $0x2f0] sm:$0xff] %v836_v61 }
 0x244   : > { %v1080_v20 = vpop.f32.mrf.mxu2  ;;  %v1181_v57 = vpop.f32.mrf.mxu3 }
 0x245   : > { %1718 = vst [vmem:[%s2453_s29 + $0x460] sm:$0xff] %v1080_v20 }
 0x246   : > { %1719 = vst.msk [vmem:[%s2453_s29 + $0x468] sm:$0xff] %vm706_vm1, %v1181_v57 }
 0x247   : > { %v943_v4 = vpop.f32.mrf.mxu1 }
 0x248   : > { %1621 = vst.msk [vmem:[%s2453_s29 + $0x318] sm:$0xff] %vm706_vm1, %v943_v4 }
 0x249   : > { %v839_v0 = vpop.f32.mrf.mxu0 }
 0x24a   : > { %1618 = vst [vmem:[%s2453_s29 + $0x300] sm:$0xff] %v839_v0 }
 0x24c   : > { %v1083_v24 = vpop.f32.mrf.mxu2  ;;  %v1184_v60 = vpop.f32.mrf.mxu3 }
 0x24d   : > { %1720 = vst [vmem:[%s2453_s29 + $0x470] sm:$0xff] %v1083_v24 }
 0x24e   : > { %1721 = vst.msk [vmem:[%s2453_s29 + $0x478] sm:$0xff] %vm706_vm1, %v1184_v60 }
 0x24f   : > { %v946_v7 = vpop.f32.mrf.mxu1 }
 0x250   : > { %1623 = vst.msk [vmem:[%s2453_s29 + $0x328] sm:$0xff] %vm706_vm1, %v946_v7 }
 0x251   : > { %v842_v3 = vpop.f32.mrf.mxu0 }
 0x252   : > { %1620 = vst [vmem:[%s2453_s29 + $0x310] sm:$0xff] %v842_v3 }
 0x254   : > { %v1086_v28 = vpop.f32.mrf.mxu2  ;;  %v1187_v63 = vpop.f32.mrf.mxu3 }
 0x255   : > { %1722 = vst [vmem:[%s2453_s29 + $0x480] sm:$0xff] %v1086_v28 }
 0x256   : > { %1723 = vst.msk [vmem:[%s2453_s29 + $0x488] sm:$0xff] %vm706_vm1, %v1187_v63 }
 0x257   : > { %v949_v10 = vpop.f32.mrf.mxu1 }
 0x258   : > { %1625 = vst.msk [vmem:[%s2453_s29 + $0x338] sm:$0xff] %vm706_vm1, %v949_v10 }
 0x259   : > { %v845_v6 = vpop.f32.mrf.mxu0 }
 0x25a   : > { %1622 = vst [vmem:[%s2453_s29 + $0x320] sm:$0xff] %v845_v6 }
 0x25c   : > { %v1089_v30 = vpop.f32.mrf.mxu2  ;;  %v1190_v2 = vpop.f32.mrf.mxu3 }
 0x25d   : > { %1724 = vst [vmem:[%s2453_s29 + $0x490] sm:$0xff] %v1089_v30 }
 0x25e   : > { %1725 = vst.msk [vmem:[%s2453_s29 + $0x498] sm:$0xff] %vm706_vm1, %v1190_v2 }
 0x25f   : > { %v952_v13 = vpop.f32.mrf.mxu1 }
 0x260   : > { %1627 = vst.msk [vmem:[%s2453_s29 + $0x348] sm:$0xff] %vm706_vm1, %v952_v13 }
 0x261   : > { %v848_v9 = vpop.f32.mrf.mxu0 }
 0x262   : > { %1624 = vst [vmem:[%s2453_s29 + $0x330] sm:$0xff] %v848_v9 }
 0x264   : > { %v1092_v32 = vpop.f32.mrf.mxu2  ;;  %v1193_v5 = vpop.f32.mrf.mxu3 }
 0x265   : > { %1726 = vst [vmem:[%s2453_s29 + $0x4a0] sm:$0xff] %v1092_v32 }
 0x266   : > { %1727 = vst.msk [vmem:[%s2453_s29 + $0x4a8] sm:$0xff] %vm706_vm1, %v1193_v5 }
 0x267   : > { %v955_v18 = vpop.f32.mrf.mxu1 }
 0x268   : > { %1629 = vst.msk [vmem:[%s2453_s29 + $0x358] sm:$0xff] %vm706_vm1, %v955_v18 }
 0x269   : > { %v851_v12 = vpop.f32.mrf.mxu0 }
 0x26a   : > { %1626 = vst [vmem:[%s2453_s29 + $0x340] sm:$0xff] %v851_v12 }
 0x26c   : > { %v1095_v34 = vpop.f32.mrf.mxu2  ;;  %v1196_v8 = vpop.f32.mrf.mxu3 }
 0x26d   : > { %1728 = vst [vmem:[%s2453_s29 + $0x4b0] sm:$0xff] %v1095_v34 }
 0x26e   : > { %1729 = vst.msk [vmem:[%s2453_s29 + $0x4b8] sm:$0xff] %vm706_vm1, %v1196_v8 }
 0x26f   : > { %v958_v29 = vpop.f32.mrf.mxu1 }
 0x270   : > { %1631 = vst.msk [vmem:[%s2453_s29 + $0x368] sm:$0xff] %vm706_vm1, %v958_v29 }
 0x271   : > { %v854_v16 = vpop.f32.mrf.mxu0 }
 0x272   : > { %1628 = vst [vmem:[%s2453_s29 + $0x350] sm:$0xff] %v854_v16 }
 0x274   : > { %v1098_v36 = vpop.f32.mrf.mxu2  ;;  %v1199_v11 = vpop.f32.mrf.mxu3 }
 0x275   : > { %1730 = vst [vmem:[%s2453_s29 + $0x4c0] sm:$0xff] %v1098_v36 }
 0x276   : > { %1731 = vst.msk [vmem:[%s2453_s29 + $0x4c8] sm:$0xff] %vm706_vm1, %v1199_v11 }
 0x277   : > { %v961_v48 = vpop.f32.mrf.mxu1 }
 0x278   : > { %1633 = vst.msk [vmem:[%s2453_s29 + $0x378] sm:$0xff] %vm706_vm1, %v961_v48 }
 0x279   : > { %v857_v27 = vpop.f32.mrf.mxu0 }
 0x27a   : > { %1630 = vst [vmem:[%s2453_s29 + $0x360] sm:$0xff] %v857_v27 }
 0x27c   : > { %v1101_v38 = vpop.f32.mrf.mxu2  ;;  %v1202_v15 = vpop.f32.mrf.mxu3 }
 0x27d   : > { %1732 = vst [vmem:[%s2453_s29 + $0x4d0] sm:$0xff] %v1101_v38 }
 0x27e   : > { %1733 = vst.msk [vmem:[%s2453_s29 + $0x4d8] sm:$0xff] %vm706_vm1, %v1202_v15 }
 0x281   : > { %v860_v43 = vpop.f32.mrf.mxu0 }
 0x282   : > { %1632 = vst [vmem:[%s2453_s29 + $0x370] sm:$0xff] %v860_v43 }
 0x284   : > { %v1104_v25 = vpop.f32.mrf.mxu2  ;;  %v1205_v26 = vpop.f32.mrf.mxu3 }
 0x285   : > { %1734 = vst [vmem:[%s2453_s29 + $0x4e0] sm:$0xff] %v1104_v25 }
 0x286   : > { %1735 = vst.msk [vmem:[%s2453_s29 + $0x4e8] sm:$0xff] %vm706_vm1, %v1205_v26 }
 0x28c   : > { %v1107_v39 = vpop.f32.mrf.mxu2  ;;  %v1208_v41 = vpop.f32.mrf.mxu3 }
 0x28d   : > { %1736 = vst [vmem:[%s2453_s29 + $0x4f0] sm:$0xff] %v1107_v39 }
 0x28e   : > { %1737 = vst.msk [vmem:[%s2453_s29 + $0x4f8] sm:$0xff] %vm706_vm1, %v1208_v41 }
 0x294   : > { %v1110_v50 = vpop.f32.mrf.mxu2  ;;  %v1211_v14 = vpop.f32.mrf.mxu3 }
 0x295   : > { %1738 = vst [vmem:[%s2453_s29 + $0x500] sm:$0xff] %v1110_v50 }
 0x296   : > { %1739 = vst.msk [vmem:[%s2453_s29 + $0x508] sm:$0xff] %vm706_vm1, %v1211_v14 }
 0x29c   : > { %v1113_v51 = vpop.f32.mrf.mxu2  ;;  %v1214_v52 = vpop.f32.mrf.mxu3 }
 0x29d   : > { %1740 = vst [vmem:[%s2453_s29 + $0x510] sm:$0xff] %v1113_v51 }
 0x29e   : > { %1741 = vst.msk [vmem:[%s2453_s29 + $0x518] sm:$0xff] %vm706_vm1, %v1214_v52 }
 0x2a4   : > { %v1116_v49 = vpop.f32.mrf.mxu2  ;;  %v1217_v53 = vpop.f32.mrf.mxu3 }
 0x2a5   : > { %1742 = vst [vmem:[%s2453_s29 + $0x520] sm:$0xff] %v1116_v49 }
 0x2a6   : > { %1743 = vst.msk [vmem:[%s2453_s29 + $0x528] sm:$0xff] %vm706_vm1, %v1217_v53 }
 0x2ac   : > { %v1119_v17 = vpop.f32.mrf.mxu2  ;;  %v1220_v54 = vpop.f32.mrf.mxu3 }
 0x2ad   : > { %1744 = vst [vmem:[%s2453_s29 + $0x530] sm:$0xff] %v1119_v17 }
 0x2ae   : > { %1745 = vst.msk [vmem:[%s2453_s29 + $0x538] sm:$0xff] %vm706_vm1, %v1220_v54 }
 0x2af   : > { %2027 = shalt.err (!%p2024_p12)
}
 0x2b0   : > { %s2089_s17 = smov 256   ;;  %s2090_s29 = smov 16  }
 0x2b1   : > { %1775 = dma.vmem_to_hbm [thread:$0]  (%p2207_p7), %s1315_s13, 21504, %s1317_s14, %s1302_s1, %s2089_s17, %s2089_s17, %s2090_s29  }
 0x2b2   : > { %p2982_p13 = pmov %p2981_p1 }
 0x2b3   : > { %p2983_p0 = pmov %p2981_p1 }
 0x2b4   : > { %2057 = dma.done.wait (%p2982_p13), [#allocation12], 16  }
 0x2b5   : > { %2059 = vsyncadd (%p2983_p0), [#allocation12], 4294967280 }
 0x2b6 PF: > { %s1348_s6 = sand.u32 1, %s2066_s18   ;;  %p2984_p3 = scmp.ge.s32.totalorder %s2078_s21, 2 }
 0x2b7   : > { %s1349_s8 = scalar_lea.sflag [#allocation4], %s1348_s6 }
 0x2b8   : > { %p1796_p5 = pnand %p2984_p3, %p2156_p6 }
 0x2ba   : > { %p1797_p1 = pneg %p1796_p5 }
 0x2bc   : > { %2061 = dma.done.wait (%p1797_p1), %s1349_s8, 21504  }
 0x2bd   : > { %2063 = vsyncadd (%p1797_p1), %s1349_s8, 4294945792  ;;  %p22_p7 = scmp.ge.s32.totalorder %s2193_s30, 4   ;;  %s2985_s18 = smov %s2070_s19 }
 0x2be   : > { %s2986_s19 = smov %s2074_s20  ;;  %s2987_s20 = smov %s2203_s9 }
 0x2bf   : > { %s2988_s21 = smov %s2193_s30  ;;  %24 = sbr.rel (!%p22_p7) target bundleno = 10 (0xa), region = 103 }
 0x2c4   :  { %1355 = vsyncpa [#allocation3], 1 }
 0x2c5   :  { %1357 = vsyncpa [#allocation3 + $0x1], 1 }
 0x2c6   :  { %1358 = vsyncpa [#allocation6], 1 }
 0x2c7   :  { %1359 = vsyncpa [#allocation9], 1 }
 0x2c8   :  { %1360 = vsyncpa [#allocation4], 1 }
 0x2c9   :  { %1362 = vsyncpa [#allocation4 + $0x1], 1 }
 0x2ca   :  { %1363 = vsyncpa [#allocation12], 1 }

</bundles_post_ra>
